<compile_context>
chip_gen: v6e
topology: v6e:2x2x1
jax: 0.10.0
libtpu: 0.0.40
codegen_flags: <defaults>
</compile_context>

<pallas_src>
import jax
import jax.numpy as jnp
from jax import lax
from jax.experimental import pallas as pl
from jax.experimental.pallas import tpu as pltpu


# ------------------------------ fused kernel ------------------------------- #

def _make_fused_decoder_kernel(NI, NL, K, L, bt, U, meta):
    """meta: list of (row_offset, true_rows, true_cols) into the packed slab,
    in the exact order the kernel consumes parameters."""
    M = bt * L
    p = K // 2

    def kernel(recv_ref, pde_ref, pin_ref, mask_ref, w_ref, o_ref):
        recv = recv_ref[...]                       # (M, 2)
        P_de = pde_ref[...]                        # (L, L)
        P_in = pin_ref[...]                        # (L, L)

        def getw(idx):
            off, r, c = meta[idx]
            return w_ref[off:off + r, :c]

        # Per-tap validity masks, pre-broadcast once per channel width used.
        widths = sorted({2, 10} | ({U} if NL > 1 else set()))
        bmask = {w: [None if t == p else
                     jnp.broadcast_to(mask_ref[:, t:t + 1], (M, w))
                     for t in range(K)]
                 for w in widths}

        def taps(h):
            """K masked, shifted copies of h (M, C) — per-sequence 'same' pad."""
            C = h.shape[1]
            cols = []
            for t in range(K):
                if t == p:
                    cols.append(h)
                else:
                    r = pltpu.roll(h, shift=(p - t) % M, axis=0)
                    cols.append(r * bmask[C][t])
            return cols

        def elu(y):
            # exp(min(y,0)) avoids overflow in the unselected branch.
            return jnp.where(y > 0.0, y, jnp.exp(jnp.minimum(y, 0.0)) - 1.0)

        def conv_rest(h, wi):
            """Conv layers 1..NL-1 (im2col + one MXU matmul + bias + ELU)."""
            for _ in range(1, NL):
                w = getw(wi)
                b = getw(wi + 1)
                wi += 2
                xcol = jnp.concatenate(taps(h), axis=1)       # (M, K*U)
                h = elu(jnp.dot(xcol, w,
                                preferred_element_type=jnp.float32) + b)
            return h, wi

        def permute(P, x):
            """Apply the (L, L) permutation P to every L-row block of x."""
            outs = [jnp.dot(P, x[b * L:(b + 1) * L, :],
                            preferred_element_type=jnp.float32)
                    for b in range(bt)]
            return outs[0] if bt == 1 else jnp.concatenate(outs, axis=0)

        # Iteration-invariant: received-symbol tap columns (M, K*2).
        recv_cols = jnp.concatenate(taps(recv), axis=1)

        prior = None                               # zeros at iteration 0
        wi = 0
        for it in range(NI):
            # ---------------- decoder step 1 ----------------
            w0 = getw(wi); b0 = getw(wi + 1); wi += 2       # (K*12, U), (1, U)
            if it == 0:                                     # prior == 0
                xcol = recv_cols
                w0 = w0[:K * 2, :]                          # recv half only
            else:
                xcol = jnp.concatenate([recv_cols] + taps(prior), axis=1)
            h = elu(jnp.dot(xcol, w0,
                            preferred_element_type=jnp.float32) + b0)
            h, wi = conv_rest(h, wi)
            wl = getw(wi); bl = getw(wi + 1); wi += 2       # (U, 10), (1, 10)
            x_plr1 = jnp.dot(h, wl, preferred_element_type=jnp.float32) + bl
            x_plr1_ex = x_plr1 if it == 0 else x_plr1 - prior
            x_de = permute(P_de, x_plr1_ex)                 # deinterleave

            # ---------------- decoder step 2 ----------------
            w0 = getw(wi); b0 = getw(wi + 1); wi += 2       # (K*10, U), (1, U)
            xcol = jnp.concatenate(taps(x_de), axis=1)
            h = elu(jnp.dot(xcol, w0,
                            preferred_element_type=jnp.float32) + b0)
            h, wi = conv_rest(h, wi)

            if it < NI - 1:
                wl = getw(wi); bl = getw(wi + 1); wi += 2   # (U, 10), (1, 10)
                x_plr2 = jnp.dot(h, wl,
                                 preferred_element_type=jnp.float32) + bl
                prior = permute(P_in, x_plr2 - x_de)        # interleave
            else:
                # Final head, lane-dense: (1, U) @ (U, M) -> (1, M).
                wrow = getw(wi); bl = getw(wi + 1); wi += 2  # (1, U), (1, 1)
                row = jnp.dot(wrow, h.T,
                              preferred_element_type=jnp.float32) + bl
                o_ref[...] = jax.nn.sigmoid(row).reshape(1, 1, M)

    return kernel


# ------------------------------ host helpers ------------------------------- #

def _pick_batch_tile(bs, L, max_rows=1024):
    """Largest divisor of bs with bt*L <= max_rows; keep >=2 grid steps when
    bs allows so v7x's two TensorCores both get work."""
    cap = max(1, max_rows // L)
    if bs >= 2:
        cap = min(cap, max(1, bs // 2))
    bt = 1
    for cand in range(1, bs + 1):
        if bs % cand == 0 and cand <= cap:
            bt = cand
    return bt


def _pack_params(params, NI, NL, K, U):
    """Pack every weight/bias into one (R, CW) f32 slab.

    Each piece's rows are padded to a multiple of 8 (so in-kernel row slices
    start sublane-aligned) and columns zero-padded to CW = max(U, 10).
    dec1 layer-0 weights are reordered so the recv-channel rows come first.
    The last iteration's dec2 head is stored transposed (1, U) so the kernel
    can emit a lane-dense (1, M) output row."""
    CW = max(U, 10)
    pieces, meta, off = [], [], 0

    def add(a):
        nonlocal off
        a = jnp.asarray(a, jnp.float32)
        r, c = a.shape
        rp = ((r + 7) // 8) * 8
        buf = jnp.zeros((rp, CW), jnp.float32).at[:r, :c].set(a)
        pieces.append(buf)
        meta.append((off, r, c))
        off += rp

    for it in range(NI):
        w0, b0 = params["dec1_cnn"][it][0]                  # (K, 12, U), (1, U)
        w0r = jnp.concatenate([w0[:, :2, :].reshape(K * 2, U),
                               w0[:, 2:, :].reshape(K * 10, U)], axis=0)
        add(w0r); add(b0)
        for l in range(1, NL):
            w, b = params["dec1_cnn"][it][l]
            add(w.reshape(-1, U)); add(b)
        add(params["dec1_lin_w"][it]); add(params["dec1_lin_b"][it])

        w0, b0 = params["dec2_cnn"][it][0]                  # (K, 10, U), (1, U)
        add(w0.reshape(-1, U)); add(b0)
        for l in range(1, NL):
            w, b = params["dec2_cnn"][it][l]
            add(w.reshape(-1, U)); add(b)
        if it == NI - 1:
            add(params["dec2_lin_w"][it].T)                 # (1, U) transposed
        else:
            add(params["dec2_lin_w"][it])
        add(params["dec2_lin_b"][it])

    return jnp.concatenate(pieces, axis=0), meta


# ------------------------- forward pass (wrapper) -------------------------- #

def dec_cnn_turbo_serial_forward(received, params, perm, inv_perm, cfg):
    bs = received.shape[0]
    L = cfg["block_len"]
    NI = cfg["num_iteration"]
    NL = cfg["dec_num_layer"]
    K = cfg["dec_kernel_size"]
    U = cfg["dec_num_unit"]
    p = K // 2

    # (bs, 2L) -> (bs*L, 2) row-stacked, channels-last.
    recv = received.astype(jnp.float32).reshape(bs * L, 2)

    bt = _pick_batch_tile(bs, L)
    M = bt * L
    G = bs // bt

    # (L, L) permutation matrices, applied per L-row block inside the kernel.
    eyeL = jnp.eye(L, dtype=jnp.float32)
    P_de = eyeL[inv_perm]               # (P_de @ x)[i] = x[inv_perm[i]]
    P_in = eyeL[perm]                   # (P_in @ x)[i] = x[perm[i]]

    # Conv tap validity: row r = b*L + i is valid for tap t iff
    # 0 <= i + t - p < L ("same" padding per sequence, no cross-batch leak).
    pos = jnp.arange(M, dtype=jnp.int32) % L
    tap_mask = jnp.stack(
        [((pos + (t - p) >= 0) & (pos + (t - p) < L)).astype(jnp.float32)
         for t in range(K)], axis=1)                        # (M, K)

    wslab, meta = _pack_params(params, NI, NL, K, U)

    kernel = _make_fused_decoder_kernel(NI, NL, K, L, bt, U, meta)

    def rep(arr):                       # grid-invariant, full-array block
        return pl.BlockSpec(arr.shape, lambda i: (0, 0))

    in_specs = [pl.BlockSpec((M, 2), lambda i: (i, 0)),
                rep(P_de), rep(P_in), rep(tap_mask), rep(wslab)]
    out_spec = pl.BlockSpec((1, 1, M), lambda i: (i, 0, 0))

    # Advisory cost estimate for the whole call.
    conv_macs = (K * 12 * U + (NL - 1) * K * U * U) \
              + (K * 10 * U + (NL - 1) * K * U * U)
    head_macs = 2 * U * 10
    perm_macs = 2 * L * 10
    flops = int(2 * bs * L * NI * (conv_macs + head_macs + perm_macs))
    transcend = int(bs * L * (NI * 2 * NL * U + 1))
    bytes_acc = int(4 * (recv.size + P_de.size + P_in.size
                         + tap_mask.size + wslab.size + bs * L))

    out = pl.pallas_call(
        kernel,
        out_shape=jax.ShapeDtypeStruct((G, 1, M), jnp.float32),
        grid_spec=pltpu.PrefetchScalarGridSpec(
            num_scalar_prefetch=0,
            grid=(G,),
            in_specs=in_specs,
            out_specs=out_spec,
        ),
        compiler_params=pltpu.CompilerParams(
            dimension_semantics=("parallel",),
            vmem_limit_bytes=48 * 1024 * 1024),
        cost_estimate=pl.CostEstimate(flops=flops,
                                      transcendentals=transcend,
                                      bytes_accessed=bytes_acc),
    )(recv, P_de, P_in, tap_mask, wslab)

    return out.reshape(bs, L)


# ----------------------- pure-JAX reference (checking) --------------------- #

def _ref_cnn(x, conv_params):
    h = jnp.transpose(x, (0, 2, 1))                             # NCW, like torch
    for (w, b) in conv_params:
        w_oik = jnp.transpose(w, (2, 1, 0))                     # (Cout, Cin, K)
        pp = w.shape[0] // 2
        h = lax.conv_general_dilated(h, w_oik, window_strides=(1,),
                                     padding=[(pp, pp)],
                                     dimension_numbers=("NCH", "OIH", "NCH"))
        h = h + b.reshape(1, -1, 1)
        h = jnp.where(h > 0.0, h, jnp.exp(h) - 1.0)
    return jnp.transpose(h, (0, 2, 1))


def _ref_dec_block(x, conv_params, wl, bl):
    return _ref_cnn(x, conv_params) @ wl + bl


def ref_forward(received, params, perm, inv_perm, cfg):
    bs = received.shape[0]
    received = received.reshape(bs, -1, 2).astype(jnp.float32)
    L = cfg["block_len"]
    prior = jnp.zeros((bs, L, 10), jnp.float32)
    x_plr2 = None
    for idx in range(cfg["num_iteration"]):
        x_in = jnp.concatenate([received, prior], axis=2)
        x_plr1 = _ref_dec_block(x_in, params["dec1_cnn"][idx],
                                params["dec1_lin_w"][idx], params["dec1_lin_b"][idx])
        x_plr1_ex = x_plr1 - prior
        x_plr1_ex_int = x_plr1_ex[:, inv_perm, :]
        x_plr2 = _ref_dec_block(x_plr1_ex_int, params["dec2_cnn"][idx],
                                params["dec2_lin_w"][idx], params["dec2_lin_b"][idx])
        x_plr2_ex = x_plr2 - x_plr1_ex_int
        prior = x_plr2_ex[:, perm, :]
    return jnp.squeeze(jax.nn.sigmoid(x_plr2), axis=2)


# ------------------------------ parameter init ----------------------------- #

def init_params(key, cfg):
    U = cfg["dec_num_unit"]
    K = cfg["dec_kernel_size"]
    NL = cfg["dec_num_layer"]
    NI = cfg["num_iteration"]

    def nrm(k, shape, scale=0.1):
        return scale * jax.random.normal(k, shape, jnp.float32)

    params = {"dec1_cnn": [], "dec2_cnn": [],
              "dec1_lin_w": [], "dec1_lin_b": [],
              "dec2_lin_w": [], "dec2_lin_b": []}
    keys = iter(jax.random.split(key, 8 * NI * (NL + 1) + 16))
    for it in range(NI):
        layers1, layers2 = [], []
        for l in range(NL):
            cin1 = (2 + 10) if l == 0 else U
            layers1.append((nrm(next(keys), (K, cin1, U)),
                            nrm(next(keys), (1, U))))
            cin2 = 10 if l == 0 else U
            layers2.append((nrm(next(keys), (K, cin2, U)),
                            nrm(next(keys), (1, U))))
        params["dec1_cnn"].append(layers1)
        params["dec2_cnn"].append(layers2)
        params["dec1_lin_w"].append(nrm(next(keys), (U, 10)))
        params["dec1_lin_b"].append(nrm(next(keys), (1, 10)))
        out2 = 1 if it == NI - 1 else 10
        params["dec2_lin_w"].append(nrm(next(keys), (U, out2)))
        params["dec2_lin_b"].append(nrm(next(keys), (1, out2)))
    return params


# ----------------------------------- main ---------------------------------- #

if __name__ == "__main__":
    cfg = dict(num_iteration=2, block_len=16, dec_num_layer=2,
               dec_num_unit=32, dec_kernel_size=5)

    key = jax.random.PRNGKey(0)
    k_par, k_perm, k_x = jax.random.split(key, 3)

    params = init_params(k_par, cfg)
    perm = jax.random.permutation(k_perm, cfg["block_len"])     # interleaver
    inv_perm = jnp.argsort(perm)                                # deinterleaver

    # received: (bs, 2*block_len), viewed inside forward as (bs, block_len, 2)
    received = jax.random.normal(k_x, (2, cfg["block_len"] * 2), jnp.float32)

    out = dec_cnn_turbo_serial_forward(received, params, perm, inv_perm, cfg)
    out = jax.block_until_ready(out)

    ref = ref_forward(received, params, perm, inv_perm, cfg)
    assert out.shape == (2, cfg["block_len"])
    assert bool(jnp.allclose(out, ref, atol=1e-4, rtol=1e-4)), (out, ref)
    print("KERNEL_OK")
</pallas_src>

<mosaic_0001>
module attributes {stable_mosaic.version = 11 : i64} {
  func.func @kernel(%arg0: i32, %arg1: memref<16x2xf32, #tpu.memory_space<vmem>>, %arg2: memref<16x16xf32, #tpu.memory_space<vmem>>, %arg3: memref<16x16xf32, #tpu.memory_space<vmem>>, %arg4: memref<16x5xf32, #tpu.memory_space<vmem>>, %arg5: memref<1080x32xf32, #tpu.memory_space<vmem>>, %arg6: memref<1x1x16xf32, #tpu.memory_space<vmem>>) attributes {dimension_semantics = [#tpu.dimension_semantics<parallel>], iteration_bounds = array<i64: 2>, scalar_prefetch = 0 : i64, scratch_operands = 0 : i64, tpu.core_type = #tpu.core_type<tc>, window_params = [{transform_indices = @transform_0, window_bounds = array<i64: 16, 2>}, {pipeline_mode = #tpu.pipeline_mode<synchronous>, transform_indices = @transform_1, window_bounds = array<i64: 16, 16>}, {pipeline_mode = #tpu.pipeline_mode<synchronous>, transform_indices = @transform_2, window_bounds = array<i64: 16, 16>}, {pipeline_mode = #tpu.pipeline_mode<synchronous>, transform_indices = @transform_3, window_bounds = array<i64: 16, 5>}, {pipeline_mode = #tpu.pipeline_mode<synchronous>, transform_indices = @transform_4, window_bounds = array<i64: 1080, 32>}, {transform_indices = @transform_5, window_bounds = array<i64: 1, 1, 16>}]} {
    %c0 = arith.constant 0 : index
    %c0_0 = arith.constant 0 : index
    %0 = vector.load %arg1[%c0, %c0_0] : memref<16x2xf32, #tpu.memory_space<vmem>>, vector<16x2xf32>
    %c0_1 = arith.constant 0 : index
    %c0_2 = arith.constant 0 : index
    %1 = vector.load %arg2[%c0_1, %c0_2] : memref<16x16xf32, #tpu.memory_space<vmem>>, vector<16x16xf32>
    %c0_3 = arith.constant 0 : index
    %c0_4 = arith.constant 0 : index
    %2 = vector.load %arg3[%c0_3, %c0_4] : memref<16x16xf32, #tpu.memory_space<vmem>>, vector<16x16xf32>
    %c0_5 = arith.constant 0 : index
    %c0_6 = arith.constant 0 : index
    %3 = vector.load %arg4[%c0_5, %c0_6] : memref<16x5xf32, #tpu.memory_space<vmem>>, vector<16x1xf32>
    %4 = vector.shape_cast %3 : vector<16x1xf32> to vector<16x1xf32>
    %5 = vector.broadcast %4 : vector<16x1xf32> to vector<16x2xf32>
    %c0_7 = arith.constant 0 : index
    %c1 = arith.constant 1 : index
    %6 = vector.load %arg4[%c0_7, %c1] : memref<16x5xf32, #tpu.memory_space<vmem>>, vector<16x1xf32>
    %7 = vector.shape_cast %6 : vector<16x1xf32> to vector<16x1xf32>
    %8 = vector.broadcast %7 : vector<16x1xf32> to vector<16x2xf32>
    %c0_8 = arith.constant 0 : index
    %c3 = arith.constant 3 : index
    %9 = vector.load %arg4[%c0_8, %c3] : memref<16x5xf32, #tpu.memory_space<vmem>>, vector<16x1xf32>
    %10 = vector.shape_cast %9 : vector<16x1xf32> to vector<16x1xf32>
    %11 = vector.broadcast %10 : vector<16x1xf32> to vector<16x2xf32>
    %c0_9 = arith.constant 0 : index
    %c4 = arith.constant 4 : index
    %12 = vector.load %arg4[%c0_9, %c4] : memref<16x5xf32, #tpu.memory_space<vmem>>, vector<16x1xf32>
    %13 = vector.shape_cast %12 : vector<16x1xf32> to vector<16x1xf32>
    %14 = vector.broadcast %13 : vector<16x1xf32> to vector<16x2xf32>
    %c0_10 = arith.constant 0 : index
    %c0_11 = arith.constant 0 : index
    %15 = vector.load %arg4[%c0_10, %c0_11] : memref<16x5xf32, #tpu.memory_space<vmem>>, vector<16x1xf32>
    %16 = vector.shape_cast %15 : vector<16x1xf32> to vector<16x1xf32>
    %17 = vector.broadcast %16 : vector<16x1xf32> to vector<16x10xf32>
    %c0_12 = arith.constant 0 : index
    %c1_13 = arith.constant 1 : index
    %18 = vector.load %arg4[%c0_12, %c1_13] : memref<16x5xf32, #tpu.memory_space<vmem>>, vector<16x1xf32>
    %19 = vector.shape_cast %18 : vector<16x1xf32> to vector<16x1xf32>
    %20 = vector.broadcast %19 : vector<16x1xf32> to vector<16x10xf32>
    %c0_14 = arith.constant 0 : index
    %c3_15 = arith.constant 3 : index
    %21 = vector.load %arg4[%c0_14, %c3_15] : memref<16x5xf32, #tpu.memory_space<vmem>>, vector<16x1xf32>
    %22 = vector.shape_cast %21 : vector<16x1xf32> to vector<16x1xf32>
    %23 = vector.broadcast %22 : vector<16x1xf32> to vector<16x10xf32>
    %c0_16 = arith.constant 0 : index
    %c4_17 = arith.constant 4 : index
    %24 = vector.load %arg4[%c0_16, %c4_17] : memref<16x5xf32, #tpu.memory_space<vmem>>, vector<16x1xf32>
    %25 = vector.shape_cast %24 : vector<16x1xf32> to vector<16x1xf32>
    %26 = vector.broadcast %25 : vector<16x1xf32> to vector<16x10xf32>
    %c0_18 = arith.constant 0 : index
    %c0_19 = arith.constant 0 : index
    %27 = vector.load %arg4[%c0_18, %c0_19] : memref<16x5xf32, #tpu.memory_space<vmem>>, vector<16x1xf32>
    %28 = vector.shape_cast %27 : vector<16x1xf32> to vector<16x1xf32>
    %29 = vector.broadcast %28 : vector<16x1xf32> to vector<16x32xf32>
    %c0_20 = arith.constant 0 : index
    %c1_21 = arith.constant 1 : index
    %30 = vector.load %arg4[%c0_20, %c1_21] : memref<16x5xf32, #tpu.memory_space<vmem>>, vector<16x1xf32>
    %31 = vector.shape_cast %30 : vector<16x1xf32> to vector<16x1xf32>
    %32 = vector.broadcast %31 : vector<16x1xf32> to vector<16x32xf32>
    %c0_22 = arith.constant 0 : index
    %c3_23 = arith.constant 3 : index
    %33 = vector.load %arg4[%c0_22, %c3_23] : memref<16x5xf32, #tpu.memory_space<vmem>>, vector<16x1xf32>
    %34 = vector.shape_cast %33 : vector<16x1xf32> to vector<16x1xf32>
    %35 = vector.broadcast %34 : vector<16x1xf32> to vector<16x32xf32>
    %c0_24 = arith.constant 0 : index
    %c4_25 = arith.constant 4 : index
    %36 = vector.load %arg4[%c0_24, %c4_25] : memref<16x5xf32, #tpu.memory_space<vmem>>, vector<16x1xf32>
    %37 = vector.shape_cast %36 : vector<16x1xf32> to vector<16x1xf32>
    %38 = vector.broadcast %37 : vector<16x1xf32> to vector<16x32xf32>
    %c2_i32 = arith.constant 2 : i32
    %39 = tpu.dynamic_rotate %0 by %c2_i32 dim 0 : vector<16x2xf32>, i32 -> vector<16x2xf32>
    %40 = arith.mulf %39, %5 : vector<16x2xf32>
    %c1_i32 = arith.constant 1 : i32
    %41 = tpu.dynamic_rotate %0 by %c1_i32 dim 0 : vector<16x2xf32>, i32 -> vector<16x2xf32>
    %42 = arith.mulf %41, %8 : vector<16x2xf32>
    %c15_i32 = arith.constant 15 : i32
    %43 = tpu.dynamic_rotate %0 by %c15_i32 dim 0 : vector<16x2xf32>, i32 -> vector<16x2xf32>
    %44 = arith.mulf %43, %11 : vector<16x2xf32>
    %c14_i32 = arith.constant 14 : i32
    %45 = tpu.dynamic_rotate %0 by %c14_i32 dim 0 : vector<16x2xf32>, i32 -> vector<16x2xf32>
    %46 = arith.mulf %45, %14 : vector<16x2xf32>
    %47 = tpu.concatenate %40, %42, %0, %44, %46 in 1 : vector<16x2xf32>, vector<16x2xf32>, vector<16x2xf32>, vector<16x2xf32>, vector<16x2xf32> -> vector<16x10xf32>
    %c0_26 = arith.constant 0 : index
    %c0_27 = arith.constant 0 : index
    %48 = vector.load %arg5[%c0_26, %c0_27] : memref<1080x32xf32, #tpu.memory_space<vmem>>, vector<60x32xf32>
    %c64 = arith.constant 64 : index
    %c0_28 = arith.constant 0 : index
    %49 = vector.load %arg5[%c64, %c0_28] : memref<1080x32xf32, #tpu.memory_space<vmem>>, vector<1x32xf32>
    %50 = vector.extract_strided_slice %48 {offsets = [0, 0], sizes = [10, 32], strides = [1, 1]} : vector<60x32xf32> to vector<10x32xf32>
    %cst = arith.constant dense<0.000000e+00> : vector<16x32xf32>
    %51 = tpu.matmul %47, %50, %cst {dimension_numbers = #tpu.dot_dimension_numbers<[1], [0], [0], [1], [0, 0, 1, 1], [], []>} : vector<16x10xf32>, vector<10x32xf32>, vector<16x32xf32> -> vector<16x32xf32>
    %52 = vector.broadcast %49 : vector<1x32xf32> to vector<16x32xf32>
    %53 = arith.addf %51, %52 : vector<16x32xf32>
    %cst_29 = arith.constant 0.000000e+00 : f32
    %54 = vector.broadcast %cst_29 : f32 to vector<16x32xf32>
    %55 = arith.cmpf ogt, %53, %54 : vector<16x32xf32>
    %cst_30 = arith.constant 0.000000e+00 : f32
    %56 = vector.broadcast %cst_30 : f32 to vector<16x32xf32>
    %57 = arith.minimumf %53, %56 : vector<16x32xf32>
    %58 = math.exp %57 : vector<16x32xf32>
    %cst_31 = arith.constant 1.000000e+00 : f32
    %59 = vector.broadcast %cst_31 : f32 to vector<16x32xf32>
    %60 = arith.subf %58, %59 : vector<16x32xf32>
    %61 = arith.select %55, %53, %60 : vector<16x32xi1>, vector<16x32xf32>
    %c72 = arith.constant 72 : index
    %c0_32 = arith.constant 0 : index
    %62 = vector.load %arg5[%c72, %c0_32] : memref<1080x32xf32, #tpu.memory_space<vmem>>, vector<160x32xf32>
    %c232 = arith.constant 232 : index
    %c0_33 = arith.constant 0 : index
    %63 = vector.load %arg5[%c232, %c0_33] : memref<1080x32xf32, #tpu.memory_space<vmem>>, vector<1x32xf32>
    %c2_i32_34 = arith.constant 2 : i32
    %64 = tpu.dynamic_rotate %61 by %c2_i32_34 dim 0 : vector<16x32xf32>, i32 -> vector<16x32xf32>
    %65 = arith.mulf %64, %29 : vector<16x32xf32>
    %c1_i32_35 = arith.constant 1 : i32
    %66 = tpu.dynamic_rotate %61 by %c1_i32_35 dim 0 : vector<16x32xf32>, i32 -> vector<16x32xf32>
    %67 = arith.mulf %66, %32 : vector<16x32xf32>
    %c15_i32_36 = arith.constant 15 : i32
    %68 = tpu.dynamic_rotate %61 by %c15_i32_36 dim 0 : vector<16x32xf32>, i32 -> vector<16x32xf32>
    %69 = arith.mulf %68, %35 : vector<16x32xf32>
    %c14_i32_37 = arith.constant 14 : i32
    %70 = tpu.dynamic_rotate %61 by %c14_i32_37 dim 0 : vector<16x32xf32>, i32 -> vector<16x32xf32>
    %71 = arith.mulf %70, %38 : vector<16x32xf32>
    %72 = tpu.concatenate %65, %67, %61, %69, %71 in 1 : vector<16x32xf32>, vector<16x32xf32>, vector<16x32xf32>, vector<16x32xf32>, vector<16x32xf32> -> vector<16x160xf32>
    %cst_38 = arith.constant dense<0.000000e+00> : vector<16x32xf32>
    %73 = tpu.matmul %72, %62, %cst_38 {dimension_numbers = #tpu.dot_dimension_numbers<[1], [0], [0], [1], [0, 0, 1, 1], [], []>} : vector<16x160xf32>, vector<160x32xf32>, vector<16x32xf32> -> vector<16x32xf32>
    %74 = vector.broadcast %63 : vector<1x32xf32> to vector<16x32xf32>
    %75 = arith.addf %73, %74 : vector<16x32xf32>
    %cst_39 = arith.constant 0.000000e+00 : f32
    %76 = vector.broadcast %cst_39 : f32 to vector<16x32xf32>
    %77 = arith.cmpf ogt, %75, %76 : vector<16x32xf32>
    %cst_40 = arith.constant 0.000000e+00 : f32
    %78 = vector.broadcast %cst_40 : f32 to vector<16x32xf32>
    %79 = arith.minimumf %75, %78 : vector<16x32xf32>
    %80 = math.exp %79 : vector<16x32xf32>
    %cst_41 = arith.constant 1.000000e+00 : f32
    %81 = vector.broadcast %cst_41 : f32 to vector<16x32xf32>
    %82 = arith.subf %80, %81 : vector<16x32xf32>
    %83 = arith.select %77, %75, %82 : vector<16x32xi1>, vector<16x32xf32>
    %c240 = arith.constant 240 : index
    %c0_42 = arith.constant 0 : index
    %84 = vector.load %arg5[%c240, %c0_42] : memref<1080x32xf32, #tpu.memory_space<vmem>>, vector<32x10xf32>
    %c272 = arith.constant 272 : index
    %c0_43 = arith.constant 0 : index
    %85 = vector.load %arg5[%c272, %c0_43] : memref<1080x32xf32, #tpu.memory_space<vmem>>, vector<1x10xf32>
    %cst_44 = arith.constant dense<0.000000e+00> : vector<16x10xf32>
    %86 = tpu.matmul %83, %84, %cst_44 {dimension_numbers = #tpu.dot_dimension_numbers<[1], [0], [0], [1], [0, 0, 1, 1], [], []>} : vector<16x32xf32>, vector<32x10xf32>, vector<16x10xf32> -> vector<16x10xf32>
    %87 = vector.broadcast %85 : vector<1x10xf32> to vector<16x10xf32>
    %88 = arith.addf %86, %87 : vector<16x10xf32>
    %cst_45 = arith.constant dense<0.000000e+00> : vector<16x10xf32>
    %89 = tpu.matmul %1, %88, %cst_45 {dimension_numbers = #tpu.dot_dimension_numbers<[1], [0], [0], [1], [0, 0, 1, 1], [], []>} : vector<16x16xf32>, vector<16x10xf32>, vector<16x10xf32> -> vector<16x10xf32>
    %c280 = arith.constant 280 : index
    %c0_46 = arith.constant 0 : index
    %90 = vector.load %arg5[%c280, %c0_46] : memref<1080x32xf32, #tpu.memory_space<vmem>>, vector<50x32xf32>
    %c336 = arith.constant 336 : index
    %c0_47 = arith.constant 0 : index
    %91 = vector.load %arg5[%c336, %c0_47] : memref<1080x32xf32, #tpu.memory_space<vmem>>, vector<1x32xf32>
    %c2_i32_48 = arith.constant 2 : i32
    %92 = tpu.dynamic_rotate %89 by %c2_i32_48 dim 0 : vector<16x10xf32>, i32 -> vector<16x10xf32>
    %93 = arith.mulf %92, %17 : vector<16x10xf32>
    %c1_i32_49 = arith.constant 1 : i32
    %94 = tpu.dynamic_rotate %89 by %c1_i32_49 dim 0 : vector<16x10xf32>, i32 -> vector<16x10xf32>
    %95 = arith.mulf %94, %20 : vector<16x10xf32>
    %c15_i32_50 = arith.constant 15 : i32
    %96 = tpu.dynamic_rotate %89 by %c15_i32_50 dim 0 : vector<16x10xf32>, i32 -> vector<16x10xf32>
    %97 = arith.mulf %96, %23 : vector<16x10xf32>
    %c14_i32_51 = arith.constant 14 : i32
    %98 = tpu.dynamic_rotate %89 by %c14_i32_51 dim 0 : vector<16x10xf32>, i32 -> vector<16x10xf32>
    %99 = arith.mulf %98, %26 : vector<16x10xf32>
    %100 = tpu.concatenate %93, %95, %89, %97, %99 in 1 : vector<16x10xf32>, vector<16x10xf32>, vector<16x10xf32>, vector<16x10xf32>, vector<16x10xf32> -> vector<16x50xf32>
    %cst_52 = arith.constant dense<0.000000e+00> : vector<16x32xf32>
    %101 = tpu.matmul %100, %90, %cst_52 {dimension_numbers = #tpu.dot_dimension_numbers<[1], [0], [0], [1], [0, 0, 1, 1], [], []>} : vector<16x50xf32>, vector<50x32xf32>, vector<16x32xf32> -> vector<16x32xf32>
    %102 = vector.broadcast %91 : vector<1x32xf32> to vector<16x32xf32>
    %103 = arith.addf %101, %102 : vector<16x32xf32>
    %cst_53 = arith.constant 0.000000e+00 : f32
    %104 = vector.broadcast %cst_53 : f32 to vector<16x32xf32>
    %105 = arith.cmpf ogt, %103, %104 : vector<16x32xf32>
    %cst_54 = arith.constant 0.000000e+00 : f32
    %106 = vector.broadcast %cst_54 : f32 to vector<16x32xf32>
    %107 = arith.minimumf %103, %106 : vector<16x32xf32>
    %108 = math.exp %107 : vector<16x32xf32>
    %cst_55 = arith.constant 1.000000e+00 : f32
    %109 = vector.broadcast %cst_55 : f32 to vector<16x32xf32>
    %110 = arith.subf %108, %109 : vector<16x32xf32>
    %111 = arith.select %105, %103, %110 : vector<16x32xi1>, vector<16x32xf32>
    %c344 = arith.constant 344 : index
    %c0_56 = arith.constant 0 : index
    %112 = vector.load %arg5[%c344, %c0_56] : memref<1080x32xf32, #tpu.memory_space<vmem>>, vector<160x32xf32>
    %c504 = arith.constant 504 : index
    %c0_57 = arith.constant 0 : index
    %113 = vector.load %arg5[%c504, %c0_57] : memref<1080x32xf32, #tpu.memory_space<vmem>>, vector<1x32xf32>
    %c2_i32_58 = arith.constant 2 : i32
    %114 = tpu.dynamic_rotate %111 by %c2_i32_58 dim 0 : vector<16x32xf32>, i32 -> vector<16x32xf32>
    %115 = arith.mulf %114, %29 : vector<16x32xf32>
    %c1_i32_59 = arith.constant 1 : i32
    %116 = tpu.dynamic_rotate %111 by %c1_i32_59 dim 0 : vector<16x32xf32>, i32 -> vector<16x32xf32>
    %117 = arith.mulf %116, %32 : vector<16x32xf32>
    %c15_i32_60 = arith.constant 15 : i32
    %118 = tpu.dynamic_rotate %111 by %c15_i32_60 dim 0 : vector<16x32xf32>, i32 -> vector<16x32xf32>
    %119 = arith.mulf %118, %35 : vector<16x32xf32>
    %c14_i32_61 = arith.constant 14 : i32
    %120 = tpu.dynamic_rotate %111 by %c14_i32_61 dim 0 : vector<16x32xf32>, i32 -> vector<16x32xf32>
    %121 = arith.mulf %120, %38 : vector<16x32xf32>
    %122 = tpu.concatenate %115, %117, %111, %119, %121 in 1 : vector<16x32xf32>, vector<16x32xf32>, vector<16x32xf32>, vector<16x32xf32>, vector<16x32xf32> -> vector<16x160xf32>
    %cst_62 = arith.constant dense<0.000000e+00> : vector<16x32xf32>
    %123 = tpu.matmul %122, %112, %cst_62 {dimension_numbers = #tpu.dot_dimension_numbers<[1], [0], [0], [1], [0, 0, 1, 1], [], []>} : vector<16x160xf32>, vector<160x32xf32>, vector<16x32xf32> -> vector<16x32xf32>
    %124 = vector.broadcast %113 : vector<1x32xf32> to vector<16x32xf32>
    %125 = arith.addf %123, %124 : vector<16x32xf32>
    %cst_63 = arith.constant 0.000000e+00 : f32
    %126 = vector.broadcast %cst_63 : f32 to vector<16x32xf32>
    %127 = arith.cmpf ogt, %125, %126 : vector<16x32xf32>
    %cst_64 = arith.constant 0.000000e+00 : f32
    %128 = vector.broadcast %cst_64 : f32 to vector<16x32xf32>
    %129 = arith.minimumf %125, %128 : vector<16x32xf32>
    %130 = math.exp %129 : vector<16x32xf32>
    %cst_65 = arith.constant 1.000000e+00 : f32
    %131 = vector.broadcast %cst_65 : f32 to vector<16x32xf32>
    %132 = arith.subf %130, %131 : vector<16x32xf32>
    %133 = arith.select %127, %125, %132 : vector<16x32xi1>, vector<16x32xf32>
    %c512 = arith.constant 512 : index
    %c0_66 = arith.constant 0 : index
    %134 = vector.load %arg5[%c512, %c0_66] : memref<1080x32xf32, #tpu.memory_space<vmem>>, vector<32x10xf32>
    %c544 = arith.constant 544 : index
    %c0_67 = arith.constant 0 : index
    %135 = vector.load %arg5[%c544, %c0_67] : memref<1080x32xf32, #tpu.memory_space<vmem>>, vector<1x10xf32>
    %cst_68 = arith.constant dense<0.000000e+00> : vector<16x10xf32>
    %136 = tpu.matmul %133, %134, %cst_68 {dimension_numbers = #tpu.dot_dimension_numbers<[1], [0], [0], [1], [0, 0, 1, 1], [], []>} : vector<16x32xf32>, vector<32x10xf32>, vector<16x10xf32> -> vector<16x10xf32>
    %137 = vector.broadcast %135 : vector<1x10xf32> to vector<16x10xf32>
    %138 = arith.addf %136, %137 : vector<16x10xf32>
    %139 = arith.subf %138, %89 : vector<16x10xf32>
    %cst_69 = arith.constant dense<0.000000e+00> : vector<16x10xf32>
    %140 = tpu.matmul %2, %139, %cst_69 {dimension_numbers = #tpu.dot_dimension_numbers<[1], [0], [0], [1], [0, 0, 1, 1], [], []>} : vector<16x16xf32>, vector<16x10xf32>, vector<16x10xf32> -> vector<16x10xf32>
    %c552 = arith.constant 552 : index
    %c0_70 = arith.constant 0 : index
    %141 = vector.load %arg5[%c552, %c0_70] : memref<1080x32xf32, #tpu.memory_space<vmem>>, vector<60x32xf32>
    %c616 = arith.constant 616 : index
    %c0_71 = arith.constant 0 : index
    %142 = vector.load %arg5[%c616, %c0_71] : memref<1080x32xf32, #tpu.memory_space<vmem>>, vector<1x32xf32>
    %c2_i32_72 = arith.constant 2 : i32
    %143 = tpu.dynamic_rotate %140 by %c2_i32_72 dim 0 : vector<16x10xf32>, i32 -> vector<16x10xf32>
    %144 = arith.mulf %143, %17 : vector<16x10xf32>
    %c1_i32_73 = arith.constant 1 : i32
    %145 = tpu.dynamic_rotate %140 by %c1_i32_73 dim 0 : vector<16x10xf32>, i32 -> vector<16x10xf32>
    %146 = arith.mulf %145, %20 : vector<16x10xf32>
    %c15_i32_74 = arith.constant 15 : i32
    %147 = tpu.dynamic_rotate %140 by %c15_i32_74 dim 0 : vector<16x10xf32>, i32 -> vector<16x10xf32>
    %148 = arith.mulf %147, %23 : vector<16x10xf32>
    %c14_i32_75 = arith.constant 14 : i32
    %149 = tpu.dynamic_rotate %140 by %c14_i32_75 dim 0 : vector<16x10xf32>, i32 -> vector<16x10xf32>
    %150 = arith.mulf %149, %26 : vector<16x10xf32>
    %151 = tpu.concatenate %47, %144, %146, %140, %148, %150 in 1 : vector<16x10xf32>, vector<16x10xf32>, vector<16x10xf32>, vector<16x10xf32>, vector<16x10xf32>, vector<16x10xf32> -> vector<16x60xf32>
    %cst_76 = arith.constant dense<0.000000e+00> : vector<16x32xf32>
    %152 = tpu.matmul %151, %141, %cst_76 {dimension_numbers = #tpu.dot_dimension_numbers<[1], [0], [0], [1], [0, 0, 1, 1], [], []>} : vector<16x60xf32>, vector<60x32xf32>, vector<16x32xf32> -> vector<16x32xf32>
    %153 = vector.broadcast %142 : vector<1x32xf32> to vector<16x32xf32>
    %154 = arith.addf %152, %153 : vector<16x32xf32>
    %cst_77 = arith.constant 0.000000e+00 : f32
    %155 = vector.broadcast %cst_77 : f32 to vector<16x32xf32>
    %156 = arith.cmpf ogt, %154, %155 : vector<16x32xf32>
    %cst_78 = arith.constant 0.000000e+00 : f32
    %157 = vector.broadcast %cst_78 : f32 to vector<16x32xf32>
    %158 = arith.minimumf %154, %157 : vector<16x32xf32>
    %159 = math.exp %158 : vector<16x32xf32>
    %cst_79 = arith.constant 1.000000e+00 : f32
    %160 = vector.broadcast %cst_79 : f32 to vector<16x32xf32>
    %161 = arith.subf %159, %160 : vector<16x32xf32>
    %162 = arith.select %156, %154, %161 : vector<16x32xi1>, vector<16x32xf32>
    %c624 = arith.constant 624 : index
    %c0_80 = arith.constant 0 : index
    %163 = vector.load %arg5[%c624, %c0_80] : memref<1080x32xf32, #tpu.memory_space<vmem>>, vector<160x32xf32>
    %c784 = arith.constant 784 : index
    %c0_81 = arith.constant 0 : index
    %164 = vector.load %arg5[%c784, %c0_81] : memref<1080x32xf32, #tpu.memory_space<vmem>>, vector<1x32xf32>
    %c2_i32_82 = arith.constant 2 : i32
    %165 = tpu.dynamic_rotate %162 by %c2_i32_82 dim 0 : vector<16x32xf32>, i32 -> vector<16x32xf32>
    %166 = arith.mulf %165, %29 : vector<16x32xf32>
    %c1_i32_83 = arith.constant 1 : i32
    %167 = tpu.dynamic_rotate %162 by %c1_i32_83 dim 0 : vector<16x32xf32>, i32 -> vector<16x32xf32>
    %168 = arith.mulf %167, %32 : vector<16x32xf32>
    %c15_i32_84 = arith.constant 15 : i32
    %169 = tpu.dynamic_rotate %162 by %c15_i32_84 dim 0 : vector<16x32xf32>, i32 -> vector<16x32xf32>
    %170 = arith.mulf %169, %35 : vector<16x32xf32>
    %c14_i32_85 = arith.constant 14 : i32
    %171 = tpu.dynamic_rotate %162 by %c14_i32_85 dim 0 : vector<16x32xf32>, i32 -> vector<16x32xf32>
    %172 = arith.mulf %171, %38 : vector<16x32xf32>
    %173 = tpu.concatenate %166, %168, %162, %170, %172 in 1 : vector<16x32xf32>, vector<16x32xf32>, vector<16x32xf32>, vector<16x32xf32>, vector<16x32xf32> -> vector<16x160xf32>
    %cst_86 = arith.constant dense<0.000000e+00> : vector<16x32xf32>
    %174 = tpu.matmul %173, %163, %cst_86 {dimension_numbers = #tpu.dot_dimension_numbers<[1], [0], [0], [1], [0, 0, 1, 1], [], []>} : vector<16x160xf32>, vector<160x32xf32>, vector<16x32xf32> -> vector<16x32xf32>
    %175 = vector.broadcast %164 : vector<1x32xf32> to vector<16x32xf32>
    %176 = arith.addf %174, %175 : vector<16x32xf32>
    %cst_87 = arith.constant 0.000000e+00 : f32
    %177 = vector.broadcast %cst_87 : f32 to vector<16x32xf32>
    %178 = arith.cmpf ogt, %176, %177 : vector<16x32xf32>
    %cst_88 = arith.constant 0.000000e+00 : f32
    %179 = vector.broadcast %cst_88 : f32 to vector<16x32xf32>
    %180 = arith.minimumf %176, %179 : vector<16x32xf32>
    %181 = math.exp %180 : vector<16x32xf32>
    %cst_89 = arith.constant 1.000000e+00 : f32
    %182 = vector.broadcast %cst_89 : f32 to vector<16x32xf32>
    %183 = arith.subf %181, %182 : vector<16x32xf32>
    %184 = arith.select %178, %176, %183 : vector<16x32xi1>, vector<16x32xf32>
    %c792 = arith.constant 792 : index
    %c0_90 = arith.constant 0 : index
    %185 = vector.load %arg5[%c792, %c0_90] : memref<1080x32xf32, #tpu.memory_space<vmem>>, vector<32x10xf32>
    %c824 = arith.constant 824 : index
    %c0_91 = arith.constant 0 : index
    %186 = vector.load %arg5[%c824, %c0_91] : memref<1080x32xf32, #tpu.memory_space<vmem>>, vector<1x10xf32>
    %cst_92 = arith.constant dense<0.000000e+00> : vector<16x10xf32>
    %187 = tpu.matmul %184, %185, %cst_92 {dimension_numbers = #tpu.dot_dimension_numbers<[1], [0], [0], [1], [0, 0, 1, 1], [], []>} : vector<16x32xf32>, vector<32x10xf32>, vector<16x10xf32> -> vector<16x10xf32>
    %188 = vector.broadcast %186 : vector<1x10xf32> to vector<16x10xf32>
    %189 = arith.addf %187, %188 : vector<16x10xf32>
    %190 = arith.subf %189, %140 : vector<16x10xf32>
    %cst_93 = arith.constant dense<0.000000e+00> : vector<16x10xf32>
    %191 = tpu.matmul %1, %190, %cst_93 {dimension_numbers = #tpu.dot_dimension_numbers<[1], [0], [0], [1], [0, 0, 1, 1], [], []>} : vector<16x16xf32>, vector<16x10xf32>, vector<16x10xf32> -> vector<16x10xf32>
    %c832 = arith.constant 832 : index
    %c0_94 = arith.constant 0 : index
    %192 = vector.load %arg5[%c832, %c0_94] : memref<1080x32xf32, #tpu.memory_space<vmem>>, vector<50x32xf32>
    %c888 = arith.constant 888 : index
    %c0_95 = arith.constant 0 : index
    %193 = vector.load %arg5[%c888, %c0_95] : memref<1080x32xf32, #tpu.memory_space<vmem>>, vector<1x32xf32>
    %c2_i32_96 = arith.constant 2 : i32
    %194 = tpu.dynamic_rotate %191 by %c2_i32_96 dim 0 : vector<16x10xf32>, i32 -> vector<16x10xf32>
    %195 = arith.mulf %194, %17 : vector<16x10xf32>
    %c1_i32_97 = arith.constant 1 : i32
    %196 = tpu.dynamic_rotate %191 by %c1_i32_97 dim 0 : vector<16x10xf32>, i32 -> vector<16x10xf32>
    %197 = arith.mulf %196, %20 : vector<16x10xf32>
    %c15_i32_98 = arith.constant 15 : i32
    %198 = tpu.dynamic_rotate %191 by %c15_i32_98 dim 0 : vector<16x10xf32>, i32 -> vector<16x10xf32>
    %199 = arith.mulf %198, %23 : vector<16x10xf32>
    %c14_i32_99 = arith.constant 14 : i32
    %200 = tpu.dynamic_rotate %191 by %c14_i32_99 dim 0 : vector<16x10xf32>, i32 -> vector<16x10xf32>
    %201 = arith.mulf %200, %26 : vector<16x10xf32>
    %202 = tpu.concatenate %195, %197, %191, %199, %201 in 1 : vector<16x10xf32>, vector<16x10xf32>, vector<16x10xf32>, vector<16x10xf32>, vector<16x10xf32> -> vector<16x50xf32>
    %cst_100 = arith.constant dense<0.000000e+00> : vector<16x32xf32>
    %203 = tpu.matmul %202, %192, %cst_100 {dimension_numbers = #tpu.dot_dimension_numbers<[1], [0], [0], [1], [0, 0, 1, 1], [], []>} : vector<16x50xf32>, vector<50x32xf32>, vector<16x32xf32> -> vector<16x32xf32>
    %204 = vector.broadcast %193 : vector<1x32xf32> to vector<16x32xf32>
    %205 = arith.addf %203, %204 : vector<16x32xf32>
    %cst_101 = arith.constant 0.000000e+00 : f32
    %206 = vector.broadcast %cst_101 : f32 to vector<16x32xf32>
    %207 = arith.cmpf ogt, %205, %206 : vector<16x32xf32>
    %cst_102 = arith.constant 0.000000e+00 : f32
    %208 = vector.broadcast %cst_102 : f32 to vector<16x32xf32>
    %209 = arith.minimumf %205, %208 : vector<16x32xf32>
    %210 = math.exp %209 : vector<16x32xf32>
    %cst_103 = arith.constant 1.000000e+00 : f32
    %211 = vector.broadcast %cst_103 : f32 to vector<16x32xf32>
    %212 = arith.subf %210, %211 : vector<16x32xf32>
    %213 = arith.select %207, %205, %212 : vector<16x32xi1>, vector<16x32xf32>
    %c896 = arith.constant 896 : index
    %c0_104 = arith.constant 0 : index
    %214 = vector.load %arg5[%c896, %c0_104] : memref<1080x32xf32, #tpu.memory_space<vmem>>, vector<160x32xf32>
    %c1056 = arith.constant 1056 : index
    %c0_105 = arith.constant 0 : index
    %215 = vector.load %arg5[%c1056, %c0_105] : memref<1080x32xf32, #tpu.memory_space<vmem>>, vector<1x32xf32>
    %c2_i32_106 = arith.constant 2 : i32
    %216 = tpu.dynamic_rotate %213 by %c2_i32_106 dim 0 : vector<16x32xf32>, i32 -> vector<16x32xf32>
    %217 = arith.mulf %216, %29 : vector<16x32xf32>
    %c1_i32_107 = arith.constant 1 : i32
    %218 = tpu.dynamic_rotate %213 by %c1_i32_107 dim 0 : vector<16x32xf32>, i32 -> vector<16x32xf32>
    %219 = arith.mulf %218, %32 : vector<16x32xf32>
    %c15_i32_108 = arith.constant 15 : i32
    %220 = tpu.dynamic_rotate %213 by %c15_i32_108 dim 0 : vector<16x32xf32>, i32 -> vector<16x32xf32>
    %221 = arith.mulf %220, %35 : vector<16x32xf32>
    %c14_i32_109 = arith.constant 14 : i32
    %222 = tpu.dynamic_rotate %213 by %c14_i32_109 dim 0 : vector<16x32xf32>, i32 -> vector<16x32xf32>
    %223 = arith.mulf %222, %38 : vector<16x32xf32>
    %224 = tpu.concatenate %217, %219, %213, %221, %223 in 1 : vector<16x32xf32>, vector<16x32xf32>, vector<16x32xf32>, vector<16x32xf32>, vector<16x32xf32> -> vector<16x160xf32>
    %cst_110 = arith.constant dense<0.000000e+00> : vector<16x32xf32>
    %225 = tpu.matmul %224, %214, %cst_110 {dimension_numbers = #tpu.dot_dimension_numbers<[1], [0], [0], [1], [0, 0, 1, 1], [], []>} : vector<16x160xf32>, vector<160x32xf32>, vector<16x32xf32> -> vector<16x32xf32>
    %226 = vector.broadcast %215 : vector<1x32xf32> to vector<16x32xf32>
    %227 = arith.addf %225, %226 : vector<16x32xf32>
    %cst_111 = arith.constant 0.000000e+00 : f32
    %228 = vector.broadcast %cst_111 : f32 to vector<16x32xf32>
    %229 = arith.cmpf ogt, %227, %228 : vector<16x32xf32>
    %cst_112 = arith.constant 0.000000e+00 : f32
    %230 = vector.broadcast %cst_112 : f32 to vector<16x32xf32>
    %231 = arith.minimumf %227, %230 : vector<16x32xf32>
    %232 = math.exp %231 : vector<16x32xf32>
    %cst_113 = arith.constant 1.000000e+00 : f32
    %233 = vector.broadcast %cst_113 : f32 to vector<16x32xf32>
    %234 = arith.subf %232, %233 : vector<16x32xf32>
    %235 = arith.select %229, %227, %234 : vector<16x32xi1>, vector<16x32xf32>
    %c1064 = arith.constant 1064 : index
    %c0_114 = arith.constant 0 : index
    %236 = vector.load %arg5[%c1064, %c0_114] : memref<1080x32xf32, #tpu.memory_space<vmem>>, vector<1x32xf32>
    %c1072 = arith.constant 1072 : index
    %c0_115 = arith.constant 0 : index
    %237 = vector.load %arg5[%c1072, %c0_115] : memref<1080x32xf32, #tpu.memory_space<vmem>>, vector<1x1xf32>
    %238 = tpu.transpose %235, [1, 0] : vector<16x32xf32> -> vector<32x16xf32>
    %cst_116 = arith.constant dense<0.000000e+00> : vector<1x16xf32>
    %239 = tpu.matmul %236, %238, %cst_116 {dimension_numbers = #tpu.dot_dimension_numbers<[1], [0], [0], [1], [0, 0, 1, 1], [], []>} : vector<1x32xf32>, vector<32x16xf32>, vector<1x16xf32> -> vector<1x16xf32>
    %240 = vector.broadcast %237 : vector<1x1xf32> to vector<1x16xf32>
    %241 = arith.addf %239, %240 : vector<1x16xf32>
    %242 = arith.negf %241 : vector<1x16xf32>
    %243 = math.exp %242 : vector<1x16xf32>
    %cst_117 = arith.constant 1.000000e+00 : f32
    %244 = vector.broadcast %cst_117 : f32 to vector<1x16xf32>
    %245 = arith.addf %244, %243 : vector<1x16xf32>
    %246 = arith.divf %244, %245 : vector<1x16xf32>
    %247 = vector.shape_cast %246 : vector<1x16xf32> to vector<1x1x16xf32>
    %c0_118 = arith.constant 0 : index
    %c0_119 = arith.constant 0 : index
    %c0_120 = arith.constant 0 : index
    %248 = vector.load %arg6[%c0_118, %c0_119, %c0_120] : memref<1x1x16xf32, #tpu.memory_space<vmem>>, vector<1x1x16xf32>
    tpu.vector_store %arg6[%c0_118, %c0_119, %c0_120], %247 {strides = array<i32>} : memref<1x1x16xf32, #tpu.memory_space<vmem>>, vector<1x1x16xf32>,
    return
  }
  func.func @transform_0(%arg0: i32) -> (i32, i32) {
    %c0_i32 = arith.constant 0 : i32
    %c0_i32_0 = arith.constant 0 : i32
    return %arg0, %c0_i32 : i32, i32
  }
  func.func @transform_1(%arg0: i32) -> (i32, i32) {
    %c0_i32 = arith.constant 0 : i32
    %c0_i32_0 = arith.constant 0 : i32
    %c0_i32_1 = arith.constant 0 : i32
    return %c0_i32, %c0_i32_0 : i32, i32
  }
  func.func @transform_2(%arg0: i32) -> (i32, i32) {
    %c0_i32 = arith.constant 0 : i32
    %c0_i32_0 = arith.constant 0 : i32
    %c0_i32_1 = arith.constant 0 : i32
    return %c0_i32, %c0_i32_0 : i32, i32
  }
  func.func @transform_3(%arg0: i32) -> (i32, i32) {
    %c0_i32 = arith.constant 0 : i32
    %c0_i32_0 = arith.constant 0 : i32
    %c0_i32_1 = arith.constant 0 : i32
    return %c0_i32, %c0_i32_0 : i32, i32
  }
  func.func @transform_4(%arg0: i32) -> (i32, i32) {
    %c0_i32 = arith.constant 0 : i32
    %c0_i32_0 = arith.constant 0 : i32
    %c0_i32_1 = arith.constant 0 : i32
    return %c0_i32, %c0_i32_0 : i32, i32
  }
  func.func @transform_5(%arg0: i32) -> (i32, i32, i32) {
    %c0_i32 = arith.constant 0 : i32
    %c0_i32_0 = arith.constant 0 : i32
    %c0_i32_1 = arith.constant 0 : i32
    return %arg0, %c0_i32, %c0_i32_0 : i32, i32, i32
  }
}

</mosaic_0001>

<bundles_post_ra>
// kernel: tpu_custom_call.1
= control target key start
LH: loop header
LB: loop body
LE: loop exit
PB: predicated region body
PF: predicated region fallthrough
CT: control target
= control target key end

     0   :  { %10 = vsyncpa [#allocation3], 0  ;;  %s3800_s0 = inlined_call_operand.vmem [shape: f32[32,2], index: 0, kind: input, shape index: {}]   ;;  %s3801_s1 = inlined_call_operand.vmem [shape: f32[16,16], index: 1, kind: input, shape index: {}]   ;;  %s3802_s2 = inlined_call_operand.vmem [shape: f32[16,16], index: 2, kind: input, shape index: {}]   ;;  %s3803_s3 = inlined_call_operand.vmem [shape: f32[16,5], index: 3, kind: input, shape index: {}]   ;;  %s3804_s4 = inlined_call_operand.vmem [shape: f32[1080,32], index: 4, kind: input, shape index: {}]   ;;  %s3805_s5 = inlined_call_operand.hbm [shape: f32[2,1,16], index: 5, kind: output, shape index: {}]  }
   0x1   :  { %12 = vsyncpa [#allocation3 + $0x1], 0  ;;  %s2813_s18 = smov 0   ;;  %s2815_s19 = smov 0  }
   0x2   :  { %s2817_s20 = smov 0   ;;  %s2819_s21 = smov 0  }
   0x3 LB: > { %s2834_s22 = sadd.s32 4294967295, %s2762_s21   ;;  %s2343_s23 = sadd.s32 4294967294, %s2762_s21   ;;  %s2762_s21 = sphi %s2819_s21, %s3811_s21   ;;  %s2758_s20 = sphi %s2817_s20, %s3810_s20   ;;  %s2754_s19 = sphi %s2815_s19, %s3809_s19   ;;  %s2750_s18 = sphi %s2813_s18, %s3808_s18  }
   0x4   : > { %s2838_s24 = sadd.s32 1, %s2762_s21   ;;  %s135_s25 = sadd.s32 1, %s2758_s20 }
   0x5   : > { %s132_s26 = ssub.s32 %s2762_s21, %s2838_s24  ;;  %p145_p0 = scmp.ne.s32.totalorder %s2758_s20, %s2754_s19 }
   0x6   : > { %p133_p1 = scmp.eq.s32.totalorder %s132_s26, 0  ;;  %p146_p2 = scmp.eq.s32.totalorder %s2834_s22, 1 }
   0x7   : > { %p151_p3 = scmp.ne.s32.totalorder %s2754_s19, %s2750_s18  ;;  %p152_p4 = scmp.eq.s32.totalorder %s2343_s23, 1 }
   0x8   : > { %s2849_s27 = scalar_select %p133_p1, %s2758_s20, %s135_s25  }
   0x9   : > { %p2851_p5 = por %p146_p2, %p145_p0  ;;  %p2855_p6 = por %p152_p4, %p151_p3 }
   0xa   : > { %p2346_p7 = scmp.ge.s32.totalorder %s2762_s21, 1  ;;  %p191_p8 = scmp.lt.s32.totalorder %s2762_s21, 3 }
   0xc   : > { %p192_p9 = pnand %p2346_p7, %p191_p8 }
   0xd   : > { %s2347_s7 = sshll.u32 (!%p192_p9), %s2834_s22, 1  ;;  %s2768_s14 = smov (!%p192_p9), 4  }
   0xe   : > { %195 = sbr.rel (%p192_p9) target bundleno = 4358 (0x1106), region = 40  ;;  %p219_p10 = scmp.lt.s32.totalorder (!%p192_p9), %s2347_s7, 3 }
   0xf   : > { %s2769_s25 = smov (!%p192_p9), 2   ;;  %s2770_s26 = smov (!%p192_p9), 6  }
  0x10   : > { %s2771_s30 = smov (!%p192_p9), 8   ;;  %s2773_s16 = smov (!%p192_p9), 64  }
  0x11   : > { %s2774_s17 = smov (!%p192_p9), 32   ;;  %s2775_s23 = smov (!%p192_p9), 96  }
  0x12   : > { %s2777_s8 = smov (!%p192_p9), 10   ;;  %s2778_s9 = smov (!%p192_p9), 30  }
  0x13   : > { %v230_v0 = vld [vmem:[%s3803_s3] sm:$0xff]  ;;  %v2764_v1 = vmov 3   ;;  %v2765_v2 = vmov 1   ;;  %v231_v3 = vld [vmem:[%s3803_s3 + $0x8] sm:$0xff]  ;;  %s3813_s7 = smov (!%p219_p10, %s2347_s7), 3  ;;  %v2766_v4 = vmov 4   ;;  %v268_v8 = vlaneseq }
  0x14   : > { %2659 = vset.pattern.permute.xlu1 %v2764_v1  ;;  %2658 = vset.pattern.permute.xlu0 %v2765_v2  ;;  %s2348_s10 = sshll.u32 %s3813_s7, 3  ;;  %v2767_v5 = vmov 0   ;;  %v341_v16 = vld [vmem:[%s3804_s4 + $0x8] sm:$0xff]  ;;  %vm354_vm2 = vcmask 1041408   ;;  %v340_v19 = vld [vmem:[%s3804_s4] sm:$0xff]  ;;  %vm328_vm5 = vcmask 15360  }
  0x15   : > { %251 = vperm.xlu1 %2659, %v230_v0   ;;  %243 = vperm.xlu0 %2658, %v230_v0   ;;  %s222_s13 = scalar_lea.vmem %s3800_s0, %s2348_s10  ;;  %v2877_v9 = vshrl.u32 %v268_v8, 7  ;;  %vm331_vm6 = vcmask 31744   ;;  %vm334_vm7 = vcmask 48128   ;;  %vm337_vm8 = vcmask 64512   ;;  %v460_v60 = vld [vmem:[%s3804_s4 + $0xc0] sm:$0xff]  ;;  %v459_v62 = vld [vmem:[%s3804_s4 + $0xb8] sm:$0xff] }
  0x16   : > { %v2871_v6 = vld [vmem:[%s222_s13 + $0x8] sm:$0xff]  ;;  %v2873_v7 = vld [vmem:[%s222_s13] sm:$0xff]  ;;  %2480 = vmatprep.subr.msk.mxu0 %vm354_vm2, %v341_v16  ;;  %vm347_vm9 = vcmask 80896   ;;  %v2772_v61 = vmov 0.0   ;;  %v458_v63 = vld [vmem:[%s3804_s4 + $0xb0] sm:$0xff]  ;;  %vm514_vm12 = vcmask 261120  }
  0x17   : > { %v275_v10 = vrot.slane %v2873_v7, 7  ;;  %v276_v11 = vrot.slane %v2871_v6, 7  ;;  %v282_v12 = vrot.slane %v2873_v7, 1  ;;  %v283_v13 = vrot.slane %v2871_v6, 1  ;;  %2481 = vmatpush3.msk.msra.mxu0 %vm354_vm2, %v341_v16  ;;  %533 = vmatprep.subr.mxu1 %v2772_v61  ;;  %v456_v1 = vld [vmem:[%s3804_s4 + $0xa0] sm:$0xff]  ;;  %v455_v2 = vld [vmem:[%s3804_s4 + $0x98] sm:$0xff] }
  0x18   : > { %vm277_vm0 = vcmp.lt.s32.totalorder %v2877_v9, 1  ;;  %vm284_vm1 = vcmp.lt.s32.totalorder %v2877_v9, 7  ;;  %2482 = vmatprep.subr.mxu0 %v340_v19  ;;  %v289_v23 = vrot.slane %v2873_v7, 2  ;;  %v290_v24 = vrot.slane %v2871_v6, 2  ;;  %534 = vmatpush1.msra.mxu1 %v460_v60  ;;  %v449_v8 = vld [vmem:[%s3804_s4 + $0x68] sm:$0xff]  ;;  %s2779_s10 = smov 40  }
  0x19   : > { %255 = vperm.xlu1 %2659, %v231_v3   ;;  %247 = vperm.xlu0 %2658, %v231_v3   ;;  %v279_v14 = vsel %vm277_vm0, %v276_v11, %v275_v10  ;;  %v285_v15 = vsel %vm284_vm1, %v282_v12, %v283_v13  ;;  %v278_v22 = vsel %vm277_vm0, %v275_v10, %v276_v11  ;;  %vm291_vm3 = vcmp.lt.s32.totalorder %v2877_v9, 6  ;;  %v448_v10 = vld [vmem:[%s3804_s4 + $0x60] sm:$0xff]  ;;  %v447_v11 = vld [vmem:[%s3804_s4 + $0x58] sm:$0xff]  ;;  %s2780_s13 = smov 50  }
  0x1a   : > { %2483 = vmatpush3.msra.mxu0 %v340_v19  ;;  %v286_v28 = vsel %vm284_vm1, %v283_v13, %v282_v12  ;;  %v292_v29 = vsel %vm291_vm3, %v289_v23, %v290_v24  ;;  %v293_v30 = vsel %vm291_vm3, %v290_v24, %v289_v23  ;;  %v267_v39 = vrot.slane %v2871_v6, 6  ;;  %535 = vmatprep.subr.mxu1 %v2772_v61  ;;  %v446_v12 = vld [vmem:[%s3804_s4 + $0x50] sm:$0xff]  ;;  %v2349_v13 = vld [vmem:[%s3804_s4 + $0x40] ss:$0 sm:$0xff]  ;;  %v445_v24 = vld [vmem:[%s3804_s4 + $0x48] sm:$0xff] }
  0x1b   : > { %v266_v40 = vrot.slane %v2873_v7, 6  ;;  %vm270_vm4 = vcmp.lt.s32.totalorder %v2877_v9, 2  ;;  %536 = vmatpush1.msra.mxu1 %v459_v62  ;;  %vm517_vm13 = vcmask 523264   ;;  %vm520_vm14 = vcmask 785408  }
  0x1c   : > { %537 = vmatprep.subr.mxu1 %v2772_v61 }
  0x1d   : > { %2660 = vset.pattern.permute.xlu0 %v2766_v4  ;;  %2661 = vset.pattern.permute.xlu1 %v2766_v4  ;;  %v272_v41 = vsel %vm270_vm4, %v267_v39, %v266_v40  ;;  %v271_v46 = vsel %vm270_vm4, %v266_v40, %v267_v39  ;;  %v453_v4 = vld [vmem:[%s3804_s4 + $0x88] sm:$0xff] }
  0x1e   : > { %259 = vperm.xlu0 %2660, %v230_v0   ;;  %263 = vperm.xlu1 %2661, %v231_v3  }
  0x1f   : > { %538 = vmatpush1.msra.mxu1 %v458_v63 }
  0x20   : > { %539 = vmatprep.subr.mxu1 %v2772_v61 }
  0x22   : > { %2662 = vset.pattern.permute.xlu1 %v2767_v5  ;;  %2663 = vset.pattern.permute.xlu0 %v2767_v5  ;;  %v452_v5 = vld [vmem:[%s3804_s4 + $0x80] sm:$0xff] }
  0x23   : > { %234 = vperm.xlu1 %2662, %v230_v0   ;;  %239 = vperm.xlu0 %2663, %v231_v3   ;;  %v457_v0 = vld [vmem:[%s3804_s4 + $0xa8] sm:$0xff]  ;;  %v454_v3 = vld [vmem:[%s3804_s4 + $0x90] sm:$0xff] }
  0x24   : > { %540 = vmatpush1.msra.mxu1 %v457_v0 }
  0x25   : > { %541 = vmatprep.subr.mxu1 %v2772_v61 }
  0x26   : > { %542 = vmatpush1.msra.mxu1 %v456_v1 }
  0x27   : > { %308 = vrot.lane.b32.xlu1 %v2871_v6, %s2768_s14  ;;  %306 = vrot.lane.b32.xlu0 %v2873_v7, %s2768_s14  ;;  %v451_v6 = vld [vmem:[%s3804_s4 + $0x78] sm:$0xff]  ;;  %v450_v7 = vld [vmem:[%s3804_s4 + $0x70] sm:$0xff] }
  0x28   : > { %543 = vmatprep.subr.mxu1 %v2772_v61 }
  0x29   : > { %544 = vmatpush1.msra.mxu1 %v455_v2 }
  0x2a   : > { %545 = vmatprep.subr.mxu1 %v2772_v61 }
  0x2b   : > { %546 = vmatpush1.msra.mxu1 %v454_v3 }
  0x2c   : > { %547 = vmatprep.subr.mxu1 %v2772_v61 }
  0x2d   : > { %548 = vmatpush1.msra.mxu1 %v453_v4 }
  0x2e   : > { %549 = vmatprep.subr.mxu1 %v2772_v61 }
  0x2f   : > { %550 = vmatpush1.msra.mxu1 %v452_v5 }
  0x30   : > { %551 = vmatprep.subr.mxu1 %v2772_v61 }
  0x31   : > { %552 = vmatpush1.msra.mxu1 %v451_v6 }
  0x32   : > { %553 = vmatprep.subr.mxu1 %v2772_v61 }
  0x33   : > { %554 = vmatpush1.msra.mxu1 %v450_v7 }
  0x34   : > { %555 = vmatprep.subr.mxu1 %v2772_v61 }
  0x35   : > { %556 = vmatpush1.msra.mxu1 %v449_v8 }
  0x36   : > { %557 = vmatprep.subr.mxu1 %v2772_v61 }
  0x37   : > { %558 = vmatpush1.msra.mxu1 %v448_v10 }
  0x38   : > { %559 = vmatprep.subr.mxu1 %v2772_v61 }
  0x39   : > { %560 = vmatpush1.msra.mxu1 %v447_v11 }
  0x3a   : > { %561 = vmatprep.subr.mxu1 %v2772_v61 }
  0x3b   : > { %562 = vmatpush1.msra.mxu1 %v446_v12 }
  0x3c   : > { %563 = vmatprep.subr.mxu1 %v2772_v61 }
  0x3d   : > { %564 = vmatpush1.msra.mxu1 %v445_v24 }
  0x3e   : > { %589 = vmatprep.subr.mxu1 %v2772_v61 }
  0x90   : > { %v2893_v17 = vpop.permute.xlu1 %251  ;;  %v2895_v18 = vpop.permute.xlu0 %243 }
  0x91   : > { %v280_v20 = vmul.f32 %v279_v14, %v2895_v18  ;;  %v287_v21 = vmul.f32 %v285_v15, %v2893_v17 }
  0x93   : > { %298 = vrot.lane.b32.xlu1 %v280_v20, %s2769_s25  ;;  %314 = vrot.lane.b32.xlu0 %v287_v21, %s2770_s26 }
  0x94   : > { %v2907_v25 = vpop.permute.xlu0 %247  ;;  %v2910_v26 = vpop.permute.xlu1 %255 }
  0x95   : > { %v281_v27 = vmul.f32 %v278_v22, %v2907_v25  ;;  %v288_v32 = vmul.f32 %v286_v28, %v2910_v26  ;;  %v463_v28 = vld [vmem:[%s3804_s4 + $0xd8] sm:$0xff] }
  0x97   : > { %300 = vrot.lane.b32.xlu1 %v281_v27, %s2769_s25  ;;  %v464_v27 = vld [vmem:[%s3804_s4 + $0xe0] sm:$0xff]  ;;  %s216_s25 = sand.u32 1, %s2754_s19  }
  0x98   : > { %590 = vmatpush2.msra.mxu1 %v464_v27  ;;  %s217_s6 = scalar_lea.vmem [#allocation2], %s216_s25 }
  0x99   : > { %v2919_v31 = vpop.permute.xlu0 %259  ;;  %v2922_v33 = vpop.permute.xlu1 %263  ;;  %591 = vmatprep.subr.mxu1 %v2772_v61  ;;  %s2288_s7 = sshll.u32 %s217_s6, 4  ;;  %s2289_s7 = int_to_ptr.vmem [resolvable:$true] %s2288_s7 }
  0x9a   : > { %v294_v34 = vmul.f32 %v292_v29, %v2919_v31  ;;  %v295_v35 = vmul.f32 %v293_v30, %v2922_v33  ;;  %v462_v29 = vld [vmem:[%s3804_s4 + $0xd0] sm:$0xff]  ;;  %592 = vmatpush2.msra.mxu1 %v463_v28 }
  0x9b   : > { %316 = vrot.lane.b32.xlu1 %v288_v32, %s2770_s26  ;;  %593 = vmatprep.subr.mxu1 %v2772_v61  ;;  %s2412_s26 = sshll.u32 %s2834_s22, 4 }
  0x9c   : > { %322 = vrot.lane.b32.xlu0 %v294_v34, %s2771_s30  ;;  %594 = vmatpush2.msra.mxu1 %v462_v29 }
  0x9d   : > { %595 = vmatprep.subr.mxu1 %v2772_v61 }
  0x9e   : > { %v2926_v36 = vpop.permute.xlu1 %234  ;;  %v2928_v37 = vpop.permute.xlu0 %239 }
  0x9f   : > { %324 = vrot.lane.b32.xlu1 %v295_v35, %s2771_s30  ;;  %v273_v44 = vmul.f32 %v272_v41, %v2926_v36  ;;  %v274_v50 = vmul.f32 %v271_v46, %v2928_v37  ;;  %v461_v35 = vld [vmem:[%s3804_s4 + $0xc8] sm:$0xff]  ;;  %s2776_s30 = smov 20  }
  0xa0   : > { %596 = vmatpush2.msra.mxu1 %v461_v35 }
  0xa2   : > { %v309_v38 = vpop.permute.xlu1 %308  ;;  %v307_v42 = vpop.permute.xlu0 %306 }
 0x105   : > { %v299_v43 = vpop.permute.xlu1 %298  ;;  %v315_v48 = vpop.permute.xlu0 %314 }
 0x106   : > { %v329_v45 = vsel %vm328_vm5, %v273_v44, %v299_v43 }
 0x107   : > { %v332_v49 = vsel %vm331_vm6, %v329_v45, %v307_v42 }
 0x108   : > { %v335_v53 = vsel %vm334_vm7, %v332_v49, %v315_v48 }
 0x109   : > { %v301_v47 = vpop.permute.xlu1 %300 }
 0x10a   : > { %v330_v51 = vsel %vm328_vm5, %v274_v50, %v301_v47 }
 0x10b   : > { %v333_v56 = vsel %vm331_vm6, %v330_v51, %v309_v38  ;;  %vm710_vm6 = vcmask 130048  }
 0x10d   : > { %v317_v52 = vpop.permute.xlu1 %316 }
 0x10e   : > { %v323_v54 = vpop.permute.xlu0 %322  ;;  %v336_v57 = vsel %vm334_vm7, %v333_v56, %v317_v52  ;;  %vm858_vm7 = vcmask 162816  }
 0x10f   : > { %v2939_v55 = vsel %vm337_vm8, %v335_v53, %v323_v54 }
 0x110   : > { %2484 = vmatprep.mubr.msk.f32.mxu0 %vm347_vm9, %v2939_v55 }
 0x111   : > { %v325_v58 = vpop.permute.xlu1 %324 }
 0x112   : > { %v2943_v59 = vsel %vm337_vm8, %v336_v57, %v325_v58  ;;  %vm861_vm8 = vcmask 244736  }
 0x113   : > { %2485 = vmatmul.mubr.msk.f32.vlgmr.msra.gmra.mxu0 %vm347_vm9, %v2943_v59 }
 0x1d3   : > { %v2486_v14 = vpop.f32.mrf.mxu0 }
 0x1d4   : > { %v430_v15 = vadd.f32 %v2486_v14, %v2349_v13 }
 0x1d5   : > { %v424_v16 = vpop.f32.mrf.mxu0 }
 0x1d6   : > { %v436_v19 = vmin.f32 %v430_v15, 0.0  ;;  %v425_v20 = vadd.f32 %v2349_v13, %v424_v16  ;;  %vm434_vm10 = vcmp.gt.f32.partialorder %v430_v15, 0.0 }
 0x1d8   : > { %v439_v21 = vmul.f32 1.442695, %v436_v19  ;;  %v435_v22 = vmin.f32 %v425_v20, 0.0  ;;  %vm433_vm11 = vcmp.gt.f32.partialorder %v425_v20, 0.0  ;;  %v623_v19 = vld [vmem:[%s3804_s4 + $0x108] sm:$0xff] }
 0x1d9   : > { %2487 = vmatprep.subr.mxu0 %v623_v19 }
 0x1da   : > { %2664 = vpow2.f32 %v439_v21  ;;  %v437_v23 = vmul.f32 1.442695, %v435_v22  ;;  %2488 = vmatpush3.msra.mxu0 %v623_v19  ;;  %v621_v21 = vld [vmem:[%s3804_s4 + $0xf8] sm:$0xff]  ;;  %v620_v22 = vld [vmem:[%s3804_s4 + $0xf0] sm:$0xff] }
 0x1dc   : > { %2666 = vpow2.f32 %v437_v23  ;;  %v2355_v23 = vld [vmem:[%s3804_s4 + $0xe8] ss:$0 sm:$0xff] }
 0x1e7   : > { %v2665_v30 = vpop.eup %2664 }
 0x1e8   : > { %v2354_v32 = vadd.f32 -1.0, %v2665_v30 }
 0x1e9   : > { %v2667_v34 = vpop.eup %2666 }
 0x1ea   : > { %v444_v38 = vsel %vm434_vm10, %v430_v15, %v2354_v32  ;;  %v2353_v39 = vadd.f32 -1.0, %v2667_v34  ;;  %vm864_vm10 = vcmask 326656  }
 0x1eb   : > { %v485_v41 = vrot.slane %v444_v38, 2  ;;  %v473_v42 = vrot.slane %v444_v38, 7  ;;  %v467_v47 = vrot.slane %v444_v38, 6  ;;  %v479_v51 = vrot.slane %v444_v38, 1 }
 0x1ec   : > { %v443_v40 = vsel %vm433_vm11, %v425_v20, %v2353_v39  ;;  %v622_v20 = vld [vmem:[%s3804_s4 + $0x100] sm:$0xff]  ;;  %vm871_vm11 = vcmask 408576  }
 0x1ed   : > { %v466_v43 = vrot.slane %v443_v40, 6  ;;  %500 = vrot.lane.b32.xlu1 %v443_v40, %s2773_s16  ;;  %v484_v44 = vrot.slane %v443_v40, 2  ;;  %v472_v45 = vrot.slane %v443_v40, 7  ;;  %v478_v46 = vrot.slane %v443_v40, 1  ;;  %2489 = vmatprep.subr.mxu0 %v622_v20 }
 0x1ee   : > { %2490 = vmatpush3.msra.mxu0 %v622_v20 }
 0x1ef   : > { %v486_v48 = vsel %vm291_vm3, %v484_v44, %v485_v41  ;;  %v475_v49 = vsel %vm277_vm0, %v473_v42, %v472_v45  ;;  %v474_v50 = vsel %vm277_vm0, %v472_v45, %v473_v42  ;;  %v480_v56 = vsel %vm284_vm1, %v478_v46, %v479_v51  ;;  %2491 = vmatprep.subr.mxu0 %v621_v21 }
 0x1f0   : > { %v488_v52 = vmul.f32 %v486_v48, %v2919_v31  ;;  %v476_v53 = vmul.f32 %v475_v49, %v2895_v18  ;;  %v477_v54 = vmul.f32 %v474_v50, %v2907_v25  ;;  %v469_v57 = vsel %vm270_vm4, %v467_v47, %v466_v43  ;;  %2492 = vmatpush3.msra.mxu0 %v621_v21 }
 0x1f1   : > { %v468_v58 = vsel %vm270_vm4, %v466_v43, %v467_v47  ;;  %v487_v60 = vsel %vm291_vm3, %v485_v41, %v484_v44  ;;  %v481_v62 = vsel %vm284_vm1, %v479_v51, %v478_v46  ;;  %v482_v63 = vmul.f32 %v480_v56, %v2893_v17  ;;  %2493 = vmatprep.subr.mxu0 %v620_v22  ;;  %v226_v46 = vld [vmem:[%s3801_s1] sm:$0xff]  ;;  %v2360_v47 = vld [vmem:[%s3804_s4 + $0x110] ss:$0 sm:$0xff]  ;;  %v796_v56 = vld [vmem:[%s3804_s4 + $0x138] sm:$0xff] }
 0x1f2   : > { %2356 = vmatprep.mubr.msk.f32.mxu1 %vm514_vm12, %v488_v52  ;;  %492 = vrot.lane.b32.xlu0 %v476_v53, %s2774_s17  ;;  %v483_v0 = vmul.f32 %v481_v62, %v2910_v26  ;;  %v470_v2 = vmul.f32 %v469_v57, %v2926_v36  ;;  %v489_v10 = vmul.f32 %v487_v60, %v2922_v33  ;;  %v227_v52 = vld [vmem:[%s3801_s1 + $0x8] sm:$0xff]  ;;  %v795_v57 = vld [vmem:[%s3804_s4 + $0x130] sm:$0xff]  ;;  %v793_v60 = vld [vmem:[%s3804_s4 + $0x120] sm:$0xff] }
 0x1f3   : > { %494 = vrot.lane.b32.xlu1 %v477_v54, %s2774_s17  ;;  %v471_v11 = vmul.f32 %v468_v58, %v2928_v37  ;;  %2494 = vmatpush3.msra.mxu0 %v620_v22  ;;  %v798_v53 = vld [vmem:[%s3804_s4 + $0x148] sm:$0x3]  ;;  %v797_v54 = vld [vmem:[%s3804_s4 + $0x140] sm:$0xff] }
 0x1f4   : > { %2505 = vmatprep.subr.msk.mxu1 %vm354_vm2, %v798_v53  ;;  %v794_v58 = vld [vmem:[%s3804_s4 + $0x128] sm:$0xff] }
 0x1f6   : > { %508 = vrot.lane.b32.xlu0 %v482_v63, %s2775_s23 }
 0x1f7   : > { %510 = vrot.lane.b32.xlu1 %v483_v0, %s2775_s23 }
 0x1fa   : > { %502 = vrot.lane.b32.xlu0 %v444_v38, %s2773_s16 }
 0x25f   : > { %v501_v1 = vpop.permute.xlu1 %500 }
 0x264   : > { %v493_v3 = vpop.permute.xlu0 %492 }
 0x265   : > { %v515_v4 = vsel %vm514_vm12, %v470_v2, %v493_v3  ;;  %v495_v5 = vpop.permute.xlu1 %494  ;;  %v792_v3 = vld [vmem:[%s3804_s4 + $0x118] sm:$0xff] }
 0x266   : > { %v518_v7 = vsel %vm517_vm13, %v515_v4, %v501_v1  ;;  %v516_v12 = vsel %vm514_vm12, %v471_v11, %v495_v5 }
 0x268   : > { %v509_v6 = vpop.permute.xlu0 %508 }
 0x269   : > { %v521_v8 = vsel %vm520_vm14, %v518_v7, %v509_v6  ;;  %v511_v14 = vpop.permute.xlu1 %510 }
 0x26a   : > { %598 = vmatmul.mubr.f32.vlgmr.msra.gmra.mxu1 %v521_v8 }
 0x26b   : > { %2357 = vmatprep.mubr.msk.f32.mxu1 %vm514_vm12, %v489_v10  ;;  %2506 = vmatpush3.msk.msra.mxu1 %vm354_vm2, %v798_v53  ;;  %v980_v53 = vld [vmem:[%s3804_s4 + $0x1b8] sm:$0xff] }
 0x26c   : > { %v503_v13 = vpop.permute.xlu0 %502  ;;  %2507 = vmatprep.subr.mxu1 %v797_v54 }
 0x26d   : > { %v519_v15 = vsel %vm517_vm13, %v516_v12, %v503_v13  ;;  %2508 = vmatpush3.msra.mxu1 %v797_v54  ;;  %v979_v54 = vld [vmem:[%s3804_s4 + $0x1b0] sm:$0xff] }
 0x26e   : > { %v522_v16 = vsel %vm520_vm14, %v519_v15, %v511_v14  ;;  %2509 = vmatprep.subr.mxu1 %v796_v56 }
 0x26f   : > { %603 = vmatmul.mubr.f32.gmra.mxu1 %v522_v16 }
 0x270   : > { %2510 = vmatpush3.msra.mxu1 %v796_v56  ;;  %v978_v56 = vld [vmem:[%s3804_s4 + $0x1a8] sm:$0xff] }
 0x271   : > { %2511 = vmatprep.subr.mxu1 %v795_v57 }
 0x272   : > { %2512 = vmatpush3.msra.mxu1 %v795_v57  ;;  %v977_v57 = vld [vmem:[%s3804_s4 + $0x1a0] sm:$0xff] }
 0x273   : > { %2513 = vmatprep.subr.mxu1 %v794_v58 }
 0x274   : > { %2514 = vmatpush3.msra.mxu1 %v794_v58  ;;  %v976_v58 = vld [vmem:[%s3804_s4 + $0x198] sm:$0xff] }
 0x275   : > { %2515 = vmatprep.subr.mxu1 %v793_v60 }
 0x276   : > { %2516 = vmatpush3.msra.mxu1 %v793_v60  ;;  %v975_v60 = vld [vmem:[%s3804_s4 + $0x190] sm:$0xff] }
 0x277   : > { %2517 = vmatprep.subr.mxu1 %v792_v3 }
 0x278   : > { %2518 = vmatpush3.msra.mxu1 %v792_v3  ;;  %v971_v3 = vld [vmem:[%s3804_s4 + $0x170] sm:$0xff] }
 0x32a   : > { %v599_v24 = vpop.f32.mrf.mxu1 }
 0x32b   : > { %v600_v27 = vadd.f32 %v2355_v23, %v599_v24 }
 0x32c   : > { %v601_v28 = vpop.f32.mrf.mxu1 }
 0x32d   : > { %v610_v29 = vmin.f32 %v600_v27, 0.0  ;;  %vm608_vm15 = vcmp.gt.f32.partialorder %v600_v27, 0.0 }
 0x32f   : > { %v612_v30 = vmul.f32 1.442695, %v610_v29  ;;  %v604_v32 = vpop.f32.mrf.mxu1 }
 0x330   : > { %v605_v34 = vadd.f32 %v2355_v23, %v604_v32 }
 0x331   : > { %2668 = vpow2.f32 %v612_v30  ;;  %v606_v35 = vpop.f32.mrf.mxu1 }
 0x332   : > { %v611_v38 = vmin.f32 %v605_v34, 0.0  ;;  %vm609_vm5 = vcmp.gt.f32.partialorder %v605_v34, 0.0 }
 0x334   : > { %v614_v39 = vmul.f32 1.442695, %v611_v38 }
 0x336   : > { %2670 = vpow2.f32 %v614_v39 }
 0x33e   : > { %v2669_v40 = vpop.eup %2668 }
 0x33f   : > { %v2358_v41 = vadd.f32 -1.0, %v2669_v40 }
 0x341   : > { %v618_v42 = vsel %vm608_vm15, %v600_v27, %v2358_v41 }
 0x342   : > { %2495 = vmatprep.mubr.msk.f32.mxu0 %vm514_vm12, %v618_v42 }
 0x343   : > { %v2671_v43 = vpop.eup %2670 }
 0x344   : > { %v2359_v44 = vadd.f32 -1.0, %v2671_v43 }
 0x346   : > { %v619_v45 = vsel %vm609_vm5, %v605_v34, %v2359_v44 }
 0x347   : > { %2496 = vmatmul.mubr.msk.f32.vlgmr.msra.gmra.mxu0 %vm514_vm12, %v619_v45 }
 0x348   : > { %2502 = vmatprep.mubr.msk.f32.mxu0 %vm710_vm6, %v226_v46 }
 0x407   : > { %v2497_v48 = vpop.f32.mrf.mxu0 }
 0x408   : > { %v707_v49 = vadd.f32 %v2497_v48, %v2360_v47 }
 0x409   : > { %v701_v50 = vpop.f32.mrf.mxu0 }
 0x40a   : > { %v702_v51 = vadd.f32 %v2360_v47, %v701_v50  ;;  %2498 = vmatprep.subr.mxu0 %v707_v49  ;;  %v983_v50 = vld [vmem:[%s3804_s4 + $0x1d0] sm:$0xff] }
 0x40b   : > { %2499 = vmatpush3.msra.mxu0 %v707_v49 }
 0x40c   : > { %2500 = vmatprep.subr.mxu0 %v702_v51 }
 0x40d   : > { %2501 = vmatpush3.msra.mxu0 %v702_v51  ;;  %v982_v51 = vld [vmem:[%s3804_s4 + $0x1c8] sm:$0xff] }
 0x40e   : > { %2503 = vmatmul.mubr.msk.f32.vlgmr.msra.gmra.mxu0 %vm710_vm6, %v227_v52  ;;  %1053 = vmatprep.subr.mxu0 %v2772_v61  ;;  %v981_v52 = vld [vmem:[%s3804_s4 + $0x1c0] sm:$0xff] }
 0x40f   : > { %1054 = vmatpush1.msra.mxu0 %v983_v50 }
 0x410   : > { %1055 = vmatprep.subr.mxu0 %v2772_v61 }
 0x411   : > { %1056 = vmatpush1.msra.mxu0 %v982_v51 }
 0x412   : > { %1057 = vmatprep.subr.mxu0 %v2772_v61 }
 0x413   : > { %1058 = vmatpush1.msra.mxu0 %v981_v52 }
 0x414   : > { %1059 = vmatprep.subr.mxu0 %v2772_v61 }
 0x415   : > { %1060 = vmatpush1.msra.mxu0 %v980_v53 }
 0x416   : > { %1061 = vmatprep.subr.mxu0 %v2772_v61 }
 0x417   : > { %1062 = vmatpush1.msra.mxu0 %v979_v54 }
 0x418   : > { %1063 = vmatprep.subr.mxu0 %v2772_v61 }
 0x419   : > { %1064 = vmatpush1.msra.mxu0 %v978_v56 }
 0x41a   : > { %1065 = vmatprep.subr.mxu0 %v2772_v61 }
 0x41b   : > { %1066 = vmatpush1.msra.mxu0 %v977_v57 }
 0x41c   : > { %1067 = vmatprep.subr.mxu0 %v2772_v61 }
 0x41d   : > { %1068 = vmatpush1.msra.mxu0 %v976_v58 }
 0x41e   : > { %1069 = vmatprep.subr.mxu0 %v2772_v61 }
 0x41f   : > { %1070 = vmatpush1.msra.mxu0 %v975_v60 }
 0x420   : > { %1071 = vmatprep.subr.mxu0 %v2772_v61 }
 0x4ce   : > { %v3117_v62 = vpop.f32.mrf.mxu0 }
 0x4cf   : > { %836 = vrot.lane.b32.xlu1 %v3117_v62, %s2776_s30  ;;  %v807_v1 = vrot.slane %v3117_v62, 7  ;;  %v813_v6 = vrot.slane %v3117_v62, 1  ;;  %v819_v13 = vrot.slane %v3117_v62, 2  ;;  %v801_v27 = vrot.slane %v3117_v62, 6 }
 0x4d0   : > { %v3121_v63 = vpop.f32.mrf.mxu0 }
 0x4d1   : > { %834 = vrot.lane.b32.xlu0 %v3121_v63, %s2776_s30  ;;  %v806_v0 = vrot.slane %v3121_v63, 7  ;;  %v812_v2 = vrot.slane %v3121_v63, 1  ;;  %v818_v12 = vrot.slane %v3121_v63, 2  ;;  %v800_v23 = vrot.slane %v3121_v63, 6 }
 0x4d3   : > { %v809_v4 = vsel %vm277_vm0, %v807_v1, %v806_v0  ;;  %v808_v5 = vsel %vm277_vm0, %v806_v0, %v807_v1  ;;  %v814_v10 = vsel %vm284_vm1, %v812_v2, %v813_v6  ;;  %v815_v11 = vsel %vm284_vm1, %v813_v6, %v812_v2  ;;  %v974_v0 = vld [vmem:[%s3804_s4 + $0x188] sm:$0xff]  ;;  %v973_v1 = vld [vmem:[%s3804_s4 + $0x180] sm:$0xff]  ;;  %v972_v2 = vld [vmem:[%s3804_s4 + $0x178] sm:$0xff] }
 0x4d4   : > { %v810_v7 = vmul.f32 %v809_v4, %v2895_v18  ;;  %v811_v8 = vmul.f32 %v808_v5, %v2907_v25  ;;  %v816_v14 = vmul.f32 %v814_v10, %v2893_v17  ;;  %v817_v15 = vmul.f32 %v815_v11, %v2910_v26  ;;  %1072 = vmatpush1.msra.mxu0 %v974_v0  ;;  %v970_v4 = vld [vmem:[%s3804_s4 + $0x168] sm:$0xff]  ;;  %v969_v5 = vld [vmem:[%s3804_s4 + $0x160] sm:$0xff]  ;;  %v2365_v6 = vld [vmem:[%s3804_s4 + $0x150] ss:$0 sm:$0xff] }
 0x4d5   : > { %v820_v16 = vsel %vm291_vm3, %v818_v12, %v819_v13  ;;  %v821_v19 = vsel %vm291_vm3, %v819_v13, %v818_v12  ;;  %v803_v28 = vsel %vm270_vm4, %v801_v27, %v800_v23  ;;  %v802_v29 = vsel %vm270_vm4, %v800_v23, %v801_v27  ;;  %1073 = vmatprep.subr.mxu0 %v2772_v61  ;;  %v984_v27 = vld [vmem:[%s3804_s4 + $0x1d8] sm:$0xff] }
 0x4d6   : > { %826 = vrot.lane.b32.xlu0 %v810_v7, %s2777_s8  ;;  %828 = vrot.lane.b32.xlu1 %v811_v8, %s2777_s8  ;;  %v822_v20 = vmul.f32 %v820_v16, %v2919_v31  ;;  %v823_v21 = vmul.f32 %v821_v19, %v2922_v33  ;;  %v804_v34 = vmul.f32 %v803_v28, %v2926_v36  ;;  %v968_v16 = vld [vmem:[%s3804_s4 + $0x158] sm:$0xff]  ;;  %v987_v19 = vld [vmem:[%s3804_s4 + $0x1f0] sm:$0xff] }
 0x4d7   : > { %v805_v35 = vmul.f32 %v802_v29, %v2928_v37  ;;  %1074 = vmatpush1.msra.mxu0 %v973_v1 }
 0x4d8   : > { %1075 = vmatprep.subr.mxu0 %v2772_v61 }
 0x4d9   : > { %1076 = vmatpush1.msra.mxu0 %v972_v2 }
 0x4da   : > { %842 = vrot.lane.b32.xlu0 %v816_v14, %s2778_s9  ;;  %844 = vrot.lane.b32.xlu1 %v817_v15, %s2778_s9 }
 0x4db   : > { %1077 = vmatprep.subr.mxu0 %v2772_v61 }
 0x4dc   : > { %1078 = vmatpush1.msra.mxu0 %v971_v3 }
 0x4dd   : > { %1079 = vmatprep.subr.mxu0 %v2772_v61 }
 0x4de   : > { %850 = vrot.lane.b32.xlu0 %v822_v20, %s2779_s10  ;;  %852 = vrot.lane.b32.xlu1 %v823_v21, %s2779_s10  ;;  %v986_v20 = vld [vmem:[%s3804_s4 + $0x1e8] sm:$0xff]  ;;  %v985_v21 = vld [vmem:[%s3804_s4 + $0x1e0] sm:$0xff] }
 0x4df   : > { %1080 = vmatpush1.msra.mxu0 %v970_v4 }
 0x4e0   : > { %1081 = vmatprep.subr.mxu0 %v2772_v61 }
 0x4e1   : > { %1082 = vmatpush1.msra.mxu0 %v969_v5 }
 0x4e2   : > { %1083 = vmatprep.subr.mxu0 %v2772_v61 }
 0x4e3   : > { %1084 = vmatpush1.msra.mxu0 %v968_v16  ;;  %v1140_v16 = vld [vmem:[%s3804_s4 + $0x200] sm:$0xff] }
 0x4e4   : > { %1109 = vmatprep.subr.mxu0 %v2772_v61 }
 0x4e5   : > { %1110 = vmatpush2.msra.mxu0 %v987_v19  ;;  %v2371_v19 = vld [vmem:[%s3804_s4 + $0x1f8] ss:$0 sm:$0xff] }
 0x4e6   : > { %1111 = vmatprep.subr.mxu0 %v2772_v61 }
 0x4e7   : > { %1112 = vmatpush2.msra.mxu0 %v986_v20 }
 0x4e8   : > { %1113 = vmatprep.subr.mxu0 %v2772_v61 }
 0x4e9   : > { %1114 = vmatpush2.msra.mxu0 %v985_v21 }
 0x4ea   : > { %1115 = vmatprep.subr.mxu0 %v2772_v61 }
 0x4eb   : > { %1116 = vmatpush2.msra.mxu0 %v984_v27 }
 0x541   : > { %v837_v24 = vpop.permute.xlu1 %836 }
 0x543   : > { %v835_v22 = vpop.permute.xlu0 %834 }
 0x548   : > { %v827_v30 = vpop.permute.xlu0 %826  ;;  %v829_v32 = vpop.permute.xlu1 %828 }
 0x549   : > { %v856_v38 = vsel %vm347_vm9, %v804_v34, %v827_v30  ;;  %v857_v39 = vsel %vm347_vm9, %v805_v35, %v829_v32 }
 0x54a   : > { %v859_v42 = vsel %vm858_vm7, %v856_v38, %v835_v22  ;;  %v860_v43 = vsel %vm858_vm7, %v857_v39, %v837_v24 }
 0x54c   : > { %v843_v40 = vpop.permute.xlu0 %842  ;;  %v845_v41 = vpop.permute.xlu1 %844 }
 0x54d   : > { %v862_v44 = vsel %vm861_vm8, %v859_v42, %v843_v40  ;;  %v863_v45 = vsel %vm861_vm8, %v860_v43, %v845_v41 }
 0x550   : > { %v851_v46 = vpop.permute.xlu0 %850  ;;  %v853_v47 = vpop.permute.xlu1 %852 }
 0x551   : > { %v865_v48 = vsel %vm864_vm10, %v862_v44, %v851_v46  ;;  %v866_v49 = vsel %vm864_vm10, %v863_v45, %v853_v47 }
 0x552   : > { %2519 = vmatprep.mubr.msk.f32.mxu1 %vm871_vm11, %v865_v48 }
 0x553   : > { %2520 = vmatmul.mubr.msk.f32.vlgmr.msra.gmra.mxu1 %vm871_vm11, %v866_v49 }
 0x613   : > { %v2521_v7 = vpop.f32.mrf.mxu1 }
 0x614   : > { %v953_v8 = vadd.f32 %v2521_v7, %v2365_v6 }
 0x615   : > { %v947_v10 = vpop.f32.mrf.mxu1 }
 0x616   : > { %v959_v11 = vmin.f32 %v953_v8, 0.0  ;;  %v948_v12 = vadd.f32 %v2365_v6, %v947_v10  ;;  %vm957_vm15 = vcmp.gt.f32.partialorder %v953_v8, 0.0 }
 0x618   : > { %v962_v13 = vmul.f32 1.442695, %v959_v11  ;;  %v958_v14 = vmin.f32 %v948_v12, 0.0  ;;  %vm956_vm5 = vcmp.gt.f32.partialorder %v948_v12, 0.0 }
 0x61a   : > { %2672 = vpow2.f32 %v962_v13  ;;  %v960_v15 = vmul.f32 1.442695, %v958_v14  ;;  %v1143_v13 = vld [vmem:[%s3804_s4 + $0x218] sm:$0xff]  ;;  %v1142_v14 = vld [vmem:[%s3804_s4 + $0x210] sm:$0xff] }
 0x61b   : > { %2522 = vmatprep.subr.mxu1 %v1143_v13 }
 0x61c   : > { %2674 = vpow2.f32 %v960_v15  ;;  %2523 = vmatpush3.msra.mxu1 %v1143_v13  ;;  %v1141_v15 = vld [vmem:[%s3804_s4 + $0x208] sm:$0xff] }
 0x61d   : > { %2524 = vmatprep.subr.mxu1 %v1142_v14 }
 0x61e   : > { %2525 = vmatpush3.msra.mxu1 %v1142_v14 }
 0x61f   : > { %2526 = vmatprep.subr.mxu1 %v1141_v15 }
 0x620   : > { %2527 = vmatpush3.msra.mxu1 %v1141_v15 }
 0x621   : > { %2528 = vmatprep.subr.mxu1 %v1140_v16 }
 0x622   : > { %2529 = vmatpush3.msra.mxu1 %v1140_v16 }
 0x627   : > { %v2673_v22 = vpop.eup %2672 }
 0x628   : > { %v2370_v23 = vadd.f32 -1.0, %v2673_v22 }
 0x629   : > { %v2675_v24 = vpop.eup %2674 }
 0x62a   : > { %v967_v28 = vsel %vm957_vm15, %v953_v8, %v2370_v23  ;;  %v2369_v29 = vadd.f32 -1.0, %v2675_v24 }
 0x62b   : > { %v1008_v30 = vrot.slane %v967_v28, 2  ;;  %v996_v34 = vrot.slane %v967_v28, 7  ;;  %v990_v41 = vrot.slane %v967_v28, 6  ;;  %v1002_v45 = vrot.slane %v967_v28, 1 }
 0x62c   : > { %v966_v32 = vsel %vm956_vm5, %v948_v12, %v2369_v29 }
 0x62d   : > { %v989_v35 = vrot.slane %v966_v32, 6  ;;  %v1007_v38 = vrot.slane %v966_v32, 2  ;;  %1023 = vrot.lane.b32.xlu1 %v966_v32, %s2773_s16  ;;  %v995_v39 = vrot.slane %v966_v32, 7  ;;  %v1001_v40 = vrot.slane %v966_v32, 1 }
 0x62f   : > { %v1009_v42 = vsel %vm291_vm3, %v1007_v38, %v1008_v30  ;;  %v998_v43 = vsel %vm277_vm0, %v996_v34, %v995_v39  ;;  %v997_v44 = vsel %vm277_vm0, %v995_v39, %v996_v34  ;;  %v1003_v49 = vsel %vm284_vm1, %v1001_v40, %v1002_v45 }
 0x630   : > { %v1011_v46 = vmul.f32 %v1009_v42, %v2919_v31  ;;  %v999_v47 = vmul.f32 %v998_v43, %v2895_v18  ;;  %v1000_v48 = vmul.f32 %v997_v44, %v2907_v25  ;;  %v992_v50 = vsel %vm270_vm4, %v990_v41, %v989_v35  ;;  %v228_v42 = vld [vmem:[%s3802_s2] sm:$0xff] }
 0x631   : > { %v991_v51 = vsel %vm270_vm4, %v989_v35, %v990_v41  ;;  %v1010_v52 = vsel %vm291_vm3, %v1008_v30, %v1007_v38  ;;  %v1004_v53 = vsel %vm284_vm1, %v1002_v45, %v1001_v40  ;;  %v1005_v54 = vmul.f32 %v1003_v49, %v2893_v17  ;;  %v2376_v43 = vld [vmem:[%s3804_s4 + $0x220] ss:$0 sm:$0xff] }
 0x632   : > { %2372 = vmatprep.mubr.msk.f32.mxu0 %vm514_vm12, %v1011_v46  ;;  %1015 = vrot.lane.b32.xlu0 %v999_v47, %s2774_s17  ;;  %v1006_v56 = vmul.f32 %v1004_v53, %v2910_v26  ;;  %v993_v58 = vmul.f32 %v992_v50, %v2926_v36  ;;  %v1012_v5 = vmul.f32 %v1010_v52, %v2922_v33  ;;  %v229_v50 = vld [vmem:[%s3802_s2 + $0x8] sm:$0xff]  ;;  %v1316_v53 = vld [vmem:[%s3804_s4 + $0x240] sm:$0xff] }
 0x633   : > { %1017 = vrot.lane.b32.xlu1 %v1000_v48, %s2774_s17  ;;  %v994_v6 = vmul.f32 %v991_v51, %v2928_v37  ;;  %v1320_v51 = vld [vmem:[%s3804_s4 + $0x260] sm:$0xf]  ;;  %v1317_v52 = vld [vmem:[%s3804_s4 + $0x248] sm:$0xff] }
 0x636   : > { %1031 = vrot.lane.b32.xlu0 %v1005_v54, %s2775_s23 }
 0x637   : > { %1033 = vrot.lane.b32.xlu1 %v1006_v56, %s2775_s23 }
 0x63a   : > { %1025 = vrot.lane.b32.xlu0 %v967_v28, %s2773_s16 }
 0x69f   : > { %v1024_v57 = vpop.permute.xlu1 %1023 }
 0x6a4   : > { %v1016_v60 = vpop.permute.xlu0 %1015 }
 0x6a5   : > { %v1037_v0 = vsel %vm514_vm12, %v993_v58, %v1016_v60  ;;  %v1018_v1 = vpop.permute.xlu1 %1017 }
 0x6a6   : > { %v1039_v3 = vsel %vm517_vm13, %v1037_v0, %v1024_v57  ;;  %v1038_v7 = vsel %vm514_vm12, %v994_v6, %v1018_v1  ;;  %v1315_v0 = vld [vmem:[%s3804_s4 + $0x238] sm:$0xff]  ;;  %v1314_v1 = vld [vmem:[%s3804_s4 + $0x230] sm:$0xff] }
 0x6a8   : > { %v1032_v2 = vpop.permute.xlu0 %1031 }
 0x6a9   : > { %v1041_v4 = vsel %vm520_vm14, %v1039_v3, %v1032_v2  ;;  %v1034_v10 = vpop.permute.xlu1 %1033 }
 0x6aa   : > { %1118 = vmatmul.mubr.f32.vlgmr.msra.gmra.mxu0 %v1041_v4 }
 0x6ab   : > { %2373 = vmatprep.mubr.msk.f32.mxu0 %vm514_vm12, %v1012_v5 }
 0x6ac   : > { %v1026_v8 = vpop.permute.xlu0 %1025 }
 0x6ad   : > { %v1040_v11 = vsel %vm517_vm13, %v1038_v7, %v1026_v8 }
 0x6ae   : > { %v1042_v12 = vsel %vm520_vm14, %v1040_v11, %v1034_v10  ;;  %v1313_v11 = vld [vmem:[%s3804_s4 + $0x228] sm:$0xff] }
 0x6af   : > { %1123 = vmatmul.mubr.f32.gmra.mxu0 %v1042_v12 }
 0x76a   : > { %v1119_v20 = vpop.f32.mrf.mxu0 }
 0x76b   : > { %v1120_v21 = vadd.f32 %v2371_v19, %v1119_v20 }
 0x76c   : > { %v1121_v22 = vpop.f32.mrf.mxu0 }
 0x76d   : > { %v1130_v23 = vmin.f32 %v1120_v21, 0.0  ;;  %vm1128_vm15 = vcmp.gt.f32.partialorder %v1120_v21, 0.0 }
 0x76f   : > { %v1132_v24 = vmul.f32 1.442695, %v1130_v23  ;;  %v1124_v27 = vpop.f32.mrf.mxu0 }
 0x770   : > { %v1125_v28 = vadd.f32 %v2371_v19, %v1124_v27 }
 0x771   : > { %2676 = vpow2.f32 %v1132_v24  ;;  %v1126_v29 = vpop.f32.mrf.mxu0 }
 0x772   : > { %v1131_v30 = vmin.f32 %v1125_v28, 0.0  ;;  %vm1129_vm5 = vcmp.gt.f32.partialorder %v1125_v28, 0.0 }
 0x774   : > { %v1134_v32 = vmul.f32 1.442695, %v1131_v30 }
 0x776   : > { %2678 = vpow2.f32 %v1134_v32 }
 0x77e   : > { %v2677_v34 = vpop.eup %2676 }
 0x77f   : > { %v2374_v35 = vadd.f32 -1.0, %v2677_v34 }
 0x781   : > { %v1138_v38 = vsel %vm1128_vm15, %v1120_v21, %v2374_v35  ;;  %vm1407_vm15 = vcmask 1043456  }
 0x782   : > { %2530 = vmatprep.mubr.msk.f32.mxu1 %vm514_vm12, %v1138_v38 }
 0x783   : > { %v2679_v39 = vpop.eup %2678 }
 0x784   : > { %v2375_v40 = vadd.f32 -1.0, %v2679_v39 }
 0x786   : > { %v1139_v41 = vsel %vm1129_vm5, %v1125_v28, %v2375_v40  ;;  %vm1400_vm5 = vcmask 490496  }
 0x787   : > { %2531 = vmatmul.mubr.msk.f32.vlgmr.msra.gmra.mxu1 %vm514_vm12, %v1139_v41 }
 0x788   : > { %2537 = vmatprep.mubr.msk.f32.mxu1 %vm710_vm6, %v228_v42 }
 0x847   : > { %v2532_v44 = vpop.f32.mrf.mxu1 }
 0x848   : > { %v1227_v45 = vadd.f32 %v2532_v44, %v2376_v43 }
 0x849   : > { %v1221_v46 = vpop.f32.mrf.mxu1 }
 0x84a   : > { %v1231_v47 = vsub.f32 %v1227_v45, %v3117_v62  ;;  %v1222_v48 = vadd.f32 %v2376_v43, %v1221_v46  ;;  %v1319_v62 = vld [vmem:[%s3804_s4 + $0x258] sm:$0xff] }
 0x84c   : > { %v1230_v49 = vsub.f32 %v1222_v48, %v3121_v63  ;;  %2533 = vmatprep.subr.mxu1 %v1231_v47  ;;  %v1318_v63 = vld [vmem:[%s3804_s4 + $0x250] sm:$0xff] }
 0x84d   : > { %2534 = vmatpush3.msra.mxu1 %v1231_v47 }
 0x84e   : > { %2535 = vmatprep.subr.mxu1 %v1230_v49 }
 0x84f   : > { %2536 = vmatpush3.msra.mxu1 %v1230_v49 }
 0x850   : > { %2538 = vmatmul.mubr.msk.f32.vlgmr.msra.gmra.mxu1 %vm710_vm6, %v229_v50  ;;  %2540 = vmatprep.subr.msk.mxu1 %vm1407_vm15, %v1320_v51 }
 0x851   : > { %2541 = vmatpush3.msk.msra.mxu1 %vm1407_vm15, %v1320_v51  ;;  %v1513_v51 = vld [vmem:[%s3804_s4 + $0x2e8] sm:$0xff] }
 0x852   : > { %2542 = vmatprep.subr.mxu1 %v1319_v62 }
 0x853   : > { %2543 = vmatpush3.msra.mxu1 %v1319_v62  ;;  %v1512_v62 = vld [vmem:[%s3804_s4 + $0x2e0] sm:$0xff] }
 0x854   : > { %2544 = vmatprep.subr.mxu1 %v1318_v63 }
 0x855   : > { %2545 = vmatpush3.msra.mxu1 %v1318_v63  ;;  %v1511_v63 = vld [vmem:[%s3804_s4 + $0x2d8] sm:$0xff] }
 0x856   : > { %2546 = vmatprep.subr.mxu1 %v1317_v52 }
 0x857   : > { %2547 = vmatpush3.msra.mxu1 %v1317_v52  ;;  %v1510_v52 = vld [vmem:[%s3804_s4 + $0x2d0] sm:$0xff] }
 0x858   : > { %2548 = vmatprep.subr.mxu1 %v1316_v53 }
 0x859   : > { %2549 = vmatpush3.msra.mxu1 %v1316_v53  ;;  %v1509_v53 = vld [vmem:[%s3804_s4 + $0x2c8] sm:$0xff] }
 0x85a   : > { %2550 = vmatprep.subr.mxu1 %v1315_v0 }
 0x85b   : > { %2551 = vmatpush3.msra.mxu1 %v1315_v0  ;;  %v1505_v0 = vld [vmem:[%s3804_s4 + $0x2a8] sm:$0xff] }
 0x85c   : > { %2552 = vmatprep.subr.mxu1 %v1314_v1 }
 0x85d   : > { %2553 = vmatpush3.msra.mxu1 %v1314_v1  ;;  %v1504_v1 = vld [vmem:[%s3804_s4 + $0x2a0] sm:$0xff] }
 0x85e   : > { %2554 = vmatprep.subr.mxu1 %v1313_v11 }
 0x85f   : > { %2555 = vmatpush3.msra.mxu1 %v1313_v11 }
 0x860   : > { %1583 = vmatprep.subr.mxu1 %v2772_v61 }
 0x910   : > { %v3341_v54 = vpop.f32.mrf.mxu1 }
 0x911   : > { %1366 = vrot.lane.b32.xlu1 %v3341_v54, %s2778_s9  ;;  %v1323_v58 = vrot.slane %v3341_v54, 6  ;;  %v1329_v4 = vrot.slane %v3341_v54, 7  ;;  %v1335_v12 = vrot.slane %v3341_v54, 1  ;;  %v1341_v20 = vrot.slane %v3341_v54, 2 }
 0x912   : > { %v3345_v56 = vpop.f32.mrf.mxu1 }
 0x913   : > { %1364 = vrot.lane.b32.xlu0 %v3345_v56, %s2778_s9  ;;  %v1322_v57 = vrot.slane %v3345_v56, 6  ;;  %v1328_v60 = vrot.slane %v3345_v56, 7  ;;  %v1334_v10 = vrot.slane %v3345_v56, 1  ;;  %v1340_v19 = vrot.slane %v3345_v56, 2 }
 0x915   : > { %v1325_v2 = vsel %vm270_vm4, %v1323_v58, %v1322_v57  ;;  %v1324_v3 = vsel %vm270_vm4, %v1322_v57, %v1323_v58  ;;  %v1331_v7 = vsel %vm277_vm0, %v1329_v4, %v1328_v60  ;;  %v1330_v8 = vsel %vm277_vm0, %v1328_v60, %v1329_v4  ;;  %v1508_v57 = vld [vmem:[%s3804_s4 + $0x2c0] sm:$0xff]  ;;  %v1507_v58 = vld [vmem:[%s3804_s4 + $0x2b8] sm:$0xff]  ;;  %v1506_v60 = vld [vmem:[%s3804_s4 + $0x2b0] sm:$0xff] }
 0x916   : > { %v1326_v5 = vmul.f32 %v1325_v2, %v2926_v36  ;;  %v1327_v6 = vmul.f32 %v1324_v3, %v2928_v37  ;;  %v1332_v13 = vmul.f32 %v1331_v7, %v2895_v18  ;;  %v1333_v14 = vmul.f32 %v1330_v8, %v2907_v25  ;;  %v1503_v2 = vld [vmem:[%s3804_s4 + $0x298] sm:$0xff]  ;;  %v1502_v3 = vld [vmem:[%s3804_s4 + $0x290] sm:$0xff]  ;;  %v1501_v4 = vld [vmem:[%s3804_s4 + $0x288] sm:$0xff] }
 0x917   : > { %v1336_v15 = vsel %vm284_vm1, %v1334_v10, %v1335_v12  ;;  %v1337_v16 = vsel %vm284_vm1, %v1335_v12, %v1334_v10  ;;  %v1342_v23 = vsel %vm291_vm3, %v1340_v19, %v1341_v20  ;;  %v1343_v24 = vsel %vm291_vm3, %v1341_v20, %v1340_v19  ;;  %v2381_v7 = vld [vmem:[%s3804_s4 + $0x268] ss:$0 sm:$0xff]  ;;  %v1498_v19 = vld [vmem:[%s3804_s4 + $0x270] sm:$0xff] }
 0x918   : > { %1348 = vrot.lane.b32.xlu0 %v1326_v5, %s2777_s8  ;;  %1350 = vrot.lane.b32.xlu1 %v1327_v6, %s2777_s8  ;;  %v1338_v21 = vmul.f32 %v1336_v15, %v2893_v17  ;;  %v1339_v22 = vmul.f32 %v1337_v16, %v2910_v26  ;;  %v1344_v27 = vmul.f32 %v1342_v23, %v2919_v31  ;;  %v1500_v5 = vld [vmem:[%s3804_s4 + $0x280] sm:$0xff]  ;;  %v1499_v6 = vld [vmem:[%s3804_s4 + $0x278] sm:$0xff] }
 0x919   : > { %v1345_v28 = vmul.f32 %v1343_v24, %v2922_v33  ;;  %v1517_v20 = vld [vmem:[%s3804_s4 + $0x308] sm:$0xff] }
 0x91c   : > { %1356 = vrot.lane.b32.xlu0 %v1332_v13, %s2776_s30  ;;  %1358 = vrot.lane.b32.xlu1 %v1333_v14, %s2776_s30 }
 0x920   : > { %1372 = vrot.lane.b32.xlu0 %v1338_v21, %s2779_s10  ;;  %1374 = vrot.lane.b32.xlu1 %v1339_v22, %s2779_s10  ;;  %v1516_v21 = vld [vmem:[%s3804_s4 + $0x300] sm:$0xff]  ;;  %v1515_v22 = vld [vmem:[%s3804_s4 + $0x2f8] sm:$0xff] }
 0x924   : > { %1380 = vrot.lane.b32.xlu0 %v1344_v27, %s2780_s13  ;;  %1382 = vrot.lane.b32.xlu1 %v1345_v28, %s2780_s13  ;;  %v1514_v28 = vld [vmem:[%s3804_s4 + $0x2f0] sm:$0xff]  ;;  %s3765_s13 = scalar_lea.hbm %s3805_s5, %s2412_s26 }
 0x983   : > { %v1367_v30 = vpop.permute.xlu1 %1366 }
 0x985   : > { %v1365_v29 = vpop.permute.xlu0 %1364 }
 0x98a   : > { %v1349_v32 = vpop.permute.xlu0 %1348  ;;  %v1351_v34 = vpop.permute.xlu1 %1350 }
 0x98b   : > { %v1386_v39 = vsel %vm347_vm9, %v2939_v55, %v1349_v32  ;;  %v1387_v40 = vsel %vm347_vm9, %v2943_v59, %v1351_v34 }
 0x98e   : > { %v1357_v35 = vpop.permute.xlu0 %1356  ;;  %v1359_v38 = vpop.permute.xlu1 %1358 }
 0x98f   : > { %v1388_v41 = vsel %vm858_vm7, %v1386_v39, %v1357_v35  ;;  %v1389_v42 = vsel %vm858_vm7, %v1387_v40, %v1359_v38 }
 0x990   : > { %v1390_v45 = vsel %vm861_vm8, %v1388_v41, %v1365_v29  ;;  %v1391_v46 = vsel %vm861_vm8, %v1389_v42, %v1367_v30 }
 0x992   : > { %v1373_v43 = vpop.permute.xlu0 %1372  ;;  %v1375_v44 = vpop.permute.xlu1 %1374 }
 0x993   : > { %v1392_v47 = vsel %vm864_vm10, %v1390_v45, %v1373_v43  ;;  %v1393_v48 = vsel %vm864_vm10, %v1391_v46, %v1375_v44 }
 0x996   : > { %v1381_v49 = vpop.permute.xlu0 %1380  ;;  %v1383_v55 = vpop.permute.xlu1 %1382 }
 0x997   : > { %v1394_v50 = vsel %vm871_vm11, %v1392_v47, %v1381_v49  ;;  %v1395_v59 = vsel %vm871_vm11, %v1393_v48, %v1383_v55 }
 0x998   : > { %2556 = vmatprep.mubr.msk.f32.mxu1 %vm1400_vm5, %v1394_v50 }
 0x999   : > { %2557 = vmatmul.mubr.msk.f32.vlgmr.msra.gmra.mxu1 %vm1400_vm5, %v1395_v59 }
 0x99a   : > { %1584 = vmatpush1.msra.mxu1 %v1513_v51 }
 0x99b   : > { %1585 = vmatprep.subr.mxu1 %v2772_v61 }
 0x99c   : > { %1586 = vmatpush1.msra.mxu1 %v1512_v62 }
 0x99d   : > { %1587 = vmatprep.subr.mxu1 %v2772_v61 }
 0x99e   : > { %1588 = vmatpush1.msra.mxu1 %v1511_v63 }
 0x99f   : > { %1589 = vmatprep.subr.mxu1 %v2772_v61 }
 0x9a0   : > { %1590 = vmatpush1.msra.mxu1 %v1510_v52 }
 0x9a1   : > { %1591 = vmatprep.subr.mxu1 %v2772_v61 }
 0x9a2   : > { %1592 = vmatpush1.msra.mxu1 %v1509_v53 }
 0x9a3   : > { %1593 = vmatprep.subr.mxu1 %v2772_v61 }
 0x9a4   : > { %1594 = vmatpush1.msra.mxu1 %v1508_v57 }
 0x9a5   : > { %1595 = vmatprep.subr.mxu1 %v2772_v61 }
 0x9a6   : > { %1596 = vmatpush1.msra.mxu1 %v1507_v58 }
 0x9a7   : > { %1597 = vmatprep.subr.mxu1 %v2772_v61 }
 0x9a8   : > { %1598 = vmatpush1.msra.mxu1 %v1506_v60 }
 0x9a9   : > { %1599 = vmatprep.subr.mxu1 %v2772_v61 }
 0x9aa   : > { %1600 = vmatpush1.msra.mxu1 %v1505_v0 }
 0x9ab   : > { %1601 = vmatprep.subr.mxu1 %v2772_v61 }
 0x9ac   : > { %1602 = vmatpush1.msra.mxu1 %v1504_v1 }
 0x9ad   : > { %1603 = vmatprep.subr.mxu1 %v2772_v61 }
 0x9ae   : > { %1604 = vmatpush1.msra.mxu1 %v1503_v2 }
 0x9af   : > { %1605 = vmatprep.subr.mxu1 %v2772_v61 }
 0x9b0   : > { %1606 = vmatpush1.msra.mxu1 %v1502_v3 }
 0x9b1   : > { %1607 = vmatprep.subr.mxu1 %v2772_v61 }
 0x9b2   : > { %1608 = vmatpush1.msra.mxu1 %v1501_v4 }
 0x9b3   : > { %1609 = vmatprep.subr.mxu1 %v2772_v61 }
 0x9b4   : > { %1610 = vmatpush1.msra.mxu1 %v1500_v5 }
 0x9b5   : > { %1611 = vmatprep.subr.mxu1 %v2772_v61 }
 0x9b6   : > { %1612 = vmatpush1.msra.mxu1 %v1499_v6 }
 0x9b7   : > { %1613 = vmatprep.subr.mxu1 %v2772_v61 }
 0x9b8   : > { %1614 = vmatpush1.msra.mxu1 %v1498_v19 }
 0x9b9   : > { %1639 = vmatprep.subr.mxu1 %v2772_v61 }
 0x9ba   : > { %1640 = vmatpush2.msra.mxu1 %v1517_v20 }
 0x9bb   : > { %1641 = vmatprep.subr.mxu1 %v2772_v61 }
 0x9bc   : > { %1642 = vmatpush2.msra.mxu1 %v1516_v21 }
 0x9bd   : > { %1643 = vmatprep.subr.mxu1 %v2772_v61 }
 0x9be   : > { %1644 = vmatpush2.msra.mxu1 %v1515_v22 }
 0x9bf   : > { %1645 = vmatprep.subr.mxu1 %v2772_v61 }
 0x9c0   : > { %1646 = vmatpush2.msra.mxu1 %v1514_v28 }
 0x9c1   : > { %2594 = vmatprep.subr.mxu1 %v2772_v61 }
 0xa59   : > { %v2558_v8 = vpop.f32.mrf.mxu1 }
 0xa5a   : > { %v1483_v10 = vadd.f32 %v2558_v8, %v2381_v7 }
 0xa5b   : > { %v1477_v11 = vpop.f32.mrf.mxu1 }
 0xa5c   : > { %v1489_v12 = vmin.f32 %v1483_v10, 0.0  ;;  %v1478_v13 = vadd.f32 %v2381_v7, %v1477_v11  ;;  %vm1487_vm15 = vcmp.gt.f32.partialorder %v1483_v10, 0.0 }
 0xa5e   : > { %v1492_v14 = vmul.f32 1.442695, %v1489_v12  ;;  %v1488_v15 = vmin.f32 %v1478_v13, 0.0  ;;  %vm1486_vm5 = vcmp.gt.f32.partialorder %v1478_v13, 0.0  ;;  %v1673_v12 = vld [vmem:[%s3804_s4 + $0x330] sm:$0xff] }
 0xa5f   : > { %2559 = vmatprep.subr.mxu0 %v1673_v12 }
 0xa60   : > { %2680 = vpow2.f32 %v1492_v14  ;;  %v1490_v16 = vmul.f32 1.442695, %v1488_v15  ;;  %2560 = vmatpush3.msra.mxu0 %v1673_v12  ;;  %v1671_v14 = vld [vmem:[%s3804_s4 + $0x320] sm:$0xff]  ;;  %v1670_v15 = vld [vmem:[%s3804_s4 + $0x318] sm:$0xff] }
 0xa62   : > { %2682 = vpow2.f32 %v1490_v16  ;;  %v2387_v16 = vld [vmem:[%s3804_s4 + $0x310] ss:$0 sm:$0xff] }
 0xa6d   : > { %v2681_v23 = vpop.eup %2680 }
 0xa6e   : > { %v2386_v24 = vadd.f32 -1.0, %v2681_v23 }
 0xa6f   : > { %v2683_v27 = vpop.eup %2682 }
 0xa70   : > { %v1497_v29 = vsel %vm1487_vm15, %v1483_v10, %v2386_v24  ;;  %v2385_v30 = vadd.f32 -1.0, %v2683_v27 }
 0xa71   : > { %v1538_v32 = vrot.slane %v1497_v29, 2  ;;  %v1526_v35 = vrot.slane %v1497_v29, 7  ;;  %v1520_v42 = vrot.slane %v1497_v29, 6  ;;  %v1532_v46 = vrot.slane %v1497_v29, 1 }
 0xa72   : > { %v1496_v34 = vsel %vm1486_vm5, %v1478_v13, %v2385_v30  ;;  %v1672_v13 = vld [vmem:[%s3804_s4 + $0x328] sm:$0xff] }
 0xa73   : > { %v1519_v38 = vrot.slane %v1496_v34, 6  ;;  %v1537_v39 = vrot.slane %v1496_v34, 2  ;;  %1553 = vrot.lane.b32.xlu1 %v1496_v34, %s2773_s16  ;;  %v1525_v40 = vrot.slane %v1496_v34, 7  ;;  %v1531_v41 = vrot.slane %v1496_v34, 1  ;;  %2561 = vmatprep.subr.mxu0 %v1672_v13 }
 0xa74   : > { %2562 = vmatpush3.msra.mxu0 %v1672_v13 }
 0xa75   : > { %v1539_v43 = vsel %vm291_vm3, %v1537_v39, %v1538_v32  ;;  %v1528_v44 = vsel %vm277_vm0, %v1526_v35, %v1525_v40  ;;  %v1527_v45 = vsel %vm277_vm0, %v1525_v40, %v1526_v35  ;;  %v1533_v55 = vsel %vm284_vm1, %v1531_v41, %v1532_v46  ;;  %2563 = vmatprep.subr.mxu0 %v1671_v14 }
 0xa76   : > { %v1541_v47 = vmul.f32 %v1539_v43, %v2919_v31  ;;  %v1529_v48 = vmul.f32 %v1528_v44, %v2895_v18  ;;  %v1530_v49 = vmul.f32 %v1527_v45, %v2907_v25  ;;  %v1522_v50 = vsel %vm270_vm4, %v1520_v42, %v1519_v38  ;;  %2564 = vmatpush3.msra.mxu0 %v1671_v14 }
 0xa77   : > { %v1521_v59 = vsel %vm270_vm4, %v1519_v38, %v1520_v42  ;;  %v1540_v51 = vsel %vm291_vm3, %v1538_v32, %v1537_v39  ;;  %v1534_v62 = vsel %vm284_vm1, %v1532_v46, %v1531_v41  ;;  %v1535_v63 = vmul.f32 %v1533_v55, %v2893_v17  ;;  %2565 = vmatprep.subr.mxu0 %v1670_v15  ;;  %v2700_v41 = vld [vmem:[%s3801_s1] sm:$0xff]  ;;  %v2392_v42 = vld [vmem:[%s3804_s4 + $0x338] ss:$0 sm:$0xff]  ;;  %v1843_v55 = vld [vmem:[%s3804_s4 + $0x370] sm:$0x3] }
 0xa78   : > { %2388 = vmatprep.mubr.msk.f32.mxu1 %vm514_vm12, %v1541_v47  ;;  %1545 = vrot.lane.b32.xlu0 %v1529_v48, %s2774_s17  ;;  %v1536_v52 = vmul.f32 %v1534_v62, %v2910_v26  ;;  %v1523_v57 = vmul.f32 %v1522_v50, %v2926_v36  ;;  %v1542_v4 = vmul.f32 %v1540_v51, %v2922_v33  ;;  %v1840_v50 = vld [vmem:[%s3804_s4 + $0x358] sm:$0xff]  ;;  %v1838_v51 = vld [vmem:[%s3804_s4 + $0x348] sm:$0xff] }
 0xa79   : > { %1547 = vrot.lane.b32.xlu1 %v1530_v49, %s2774_s17  ;;  %v1524_v5 = vmul.f32 %v1521_v59, %v2928_v37  ;;  %2566 = vmatpush3.msra.mxu0 %v1670_v15  ;;  %v2701_v49 = vld [vmem:[%s3801_s1 + $0x8] sm:$0xff]  ;;  %v1839_v59 = vld [vmem:[%s3804_s4 + $0x350] sm:$0xff] }
 0xa7c   : > { %1561 = vrot.lane.b32.xlu0 %v1535_v63, %s2775_s23 }
 0xa7d   : > { %1563 = vrot.lane.b32.xlu1 %v1536_v52, %s2775_s23 }
 0xa80   : > { %1555 = vrot.lane.b32.xlu0 %v1497_v29, %s2773_s16 }
 0xae5   : > { %v1554_v53 = vpop.permute.xlu1 %1553 }
 0xaea   : > { %v1546_v58 = vpop.permute.xlu0 %1545 }
 0xaeb   : > { %v1567_v60 = vsel %vm514_vm12, %v1523_v57, %v1546_v58  ;;  %v1548_v0 = vpop.permute.xlu1 %1547  ;;  %v1837_v58 = vld [vmem:[%s3804_s4 + $0x340] sm:$0xff] }
 0xaec   : > { %v1569_v2 = vsel %vm517_vm13, %v1567_v60, %v1554_v53  ;;  %v1568_v6 = vsel %vm514_vm12, %v1524_v5, %v1548_v0 }
 0xaee   : > { %v1562_v1 = vpop.permute.xlu0 %1561 }
 0xaef   : > { %v1571_v3 = vsel %vm520_vm14, %v1569_v2, %v1562_v1  ;;  %v1564_v8 = vpop.permute.xlu1 %1563 }
 0xaf0   : > { %1648 = vmatmul.mubr.f32.vlgmr.msra.gmra.mxu1 %v1571_v3 }
 0xaf1   : > { %2389 = vmatprep.mubr.msk.f32.mxu1 %vm514_vm12, %v1542_v4 }
 0xaf2   : > { %v1556_v7 = vpop.permute.xlu0 %1555 }
 0xaf3   : > { %v1570_v10 = vsel %vm517_vm13, %v1568_v6, %v1556_v7 }
 0xaf4   : > { %v1572_v11 = vsel %vm520_vm14, %v1570_v10, %v1564_v8 }
 0xaf5   : > { %1653 = vmatmul.mubr.f32.gmra.mxu1 %v1572_v11 }
 0xbb0   : > { %v1649_v19 = vpop.f32.mrf.mxu1 }
 0xbb1   : > { %v1650_v20 = vadd.f32 %v2387_v16, %v1649_v19 }
 0xbb2   : > { %v1651_v21 = vpop.f32.mrf.mxu1 }
 0xbb3   : > { %v1660_v22 = vmin.f32 %v1650_v20, 0.0  ;;  %vm1658_vm15 = vcmp.gt.f32.partialorder %v1650_v20, 0.0 }
 0xbb5   : > { %v1662_v23 = vmul.f32 1.442695, %v1660_v22  ;;  %v1654_v24 = vpop.f32.mrf.mxu1 }
 0xbb6   : > { %v1655_v27 = vadd.f32 %v2387_v16, %v1654_v24 }
 0xbb7   : > { %2684 = vpow2.f32 %v1662_v23  ;;  %v1656_v28 = vpop.f32.mrf.mxu1 }
 0xbb8   : > { %v1661_v29 = vmin.f32 %v1655_v27, 0.0  ;;  %vm1659_vm5 = vcmp.gt.f32.partialorder %v1655_v27, 0.0 }
 0xbba   : > { %v1664_v30 = vmul.f32 1.442695, %v1661_v29 }
 0xbbc   : > { %2686 = vpow2.f32 %v1664_v30 }
 0xbc4   : > { %v2685_v32 = vpop.eup %2684 }
 0xbc5   : > { %v2390_v34 = vadd.f32 -1.0, %v2685_v32 }
 0xbc7   : > { %v1668_v35 = vsel %vm1658_vm15, %v1650_v20, %v2390_v34 }
 0xbc8   : > { %2567 = vmatprep.mubr.msk.f32.mxu0 %vm514_vm12, %v1668_v35 }
 0xbc9   : > { %v2687_v38 = vpop.eup %2686 }
 0xbca   : > { %v2391_v39 = vadd.f32 -1.0, %v2687_v38 }
 0xbcc   : > { %v1669_v40 = vsel %vm1659_vm5, %v1655_v27, %v2391_v39 }
 0xbcd   : > { %2568 = vmatmul.mubr.msk.f32.vlgmr.msra.gmra.mxu0 %vm514_vm12, %v1669_v40 }
 0xbce   : > { %2574 = vmatprep.mubr.msk.f32.mxu0 %vm710_vm6, %v2700_v41 }
 0xc8d   : > { %v2569_v43 = vpop.f32.mrf.mxu0 }
 0xc8e   : > { %v1757_v44 = vadd.f32 %v2569_v43, %v2392_v42 }
 0xc8f   : > { %v1751_v45 = vpop.f32.mrf.mxu0 }
 0xc90   : > { %v1761_v46 = vsub.f32 %v1757_v44, %v3341_v54  ;;  %v1752_v47 = vadd.f32 %v2392_v42, %v1751_v45  ;;  %v1842_v54 = vld [vmem:[%s3804_s4 + $0x368] sm:$0xff]  ;;  %v2024_v45 = vld [vmem:[%s3804_s4 + $0x3f8] sm:$0xff] }
 0xc92   : > { %v1760_v48 = vsub.f32 %v1752_v47, %v3345_v56  ;;  %2570 = vmatprep.subr.mxu0 %v1761_v46  ;;  %v1841_v56 = vld [vmem:[%s3804_s4 + $0x360] sm:$0xff]  ;;  %v2022_v47 = vld [vmem:[%s3804_s4 + $0x3e8] sm:$0xff] }
 0xc93   : > { %2571 = vmatpush3.msra.mxu0 %v1761_v46  ;;  %v2023_v46 = vld [vmem:[%s3804_s4 + $0x3f0] sm:$0xff] }
 0xc94   : > { %2572 = vmatprep.subr.mxu0 %v1760_v48 }
 0xc95   : > { %2573 = vmatpush3.msra.mxu0 %v1760_v48  ;;  %v2021_v48 = vld [vmem:[%s3804_s4 + $0x3e0] sm:$0xff] }
 0xc96   : > { %2575 = vmatmul.mubr.msk.f32.vlgmr.msra.gmra.mxu0 %vm710_vm6, %v2701_v49  ;;  %2577 = vmatprep.subr.msk.mxu0 %vm354_vm2, %v1843_v55  ;;  %v2020_v49 = vld [vmem:[%s3804_s4 + $0x3d8] sm:$0xff] }
 0xc97   : > { %2578 = vmatpush3.msk.msra.mxu0 %vm354_vm2, %v1843_v55  ;;  %v2019_v55 = vld [vmem:[%s3804_s4 + $0x3d0] sm:$0xff] }
 0xc98   : > { %2579 = vmatprep.subr.mxu0 %v1842_v54 }
 0xc99   : > { %2580 = vmatpush3.msra.mxu0 %v1842_v54  ;;  %v2018_v54 = vld [vmem:[%s3804_s4 + $0x3c8] sm:$0xff] }
 0xc9a   : > { %2581 = vmatprep.subr.mxu0 %v1841_v56 }
 0xc9b   : > { %2582 = vmatpush3.msra.mxu0 %v1841_v56  ;;  %v2017_v56 = vld [vmem:[%s3804_s4 + $0x3c0] sm:$0xff] }
 0xc9c   : > { %2583 = vmatprep.subr.mxu0 %v1840_v50 }
 0xc9d   : > { %2584 = vmatpush3.msra.mxu0 %v1840_v50  ;;  %v2016_v50 = vld [vmem:[%s3804_s4 + $0x3b8] sm:$0xff] }
 0xc9e   : > { %2585 = vmatprep.subr.mxu0 %v1839_v59 }
 0xc9f   : > { %2586 = vmatpush3.msra.mxu0 %v1839_v59  ;;  %v2015_v59 = vld [vmem:[%s3804_s4 + $0x3b0] sm:$0xff] }
 0xca0   : > { %2587 = vmatprep.subr.mxu0 %v1838_v51 }
 0xca1   : > { %2588 = vmatpush3.msra.mxu0 %v1838_v51  ;;  %v2014_v51 = vld [vmem:[%s3804_s4 + $0x3a8] sm:$0xff] }
 0xca2   : > { %2589 = vmatprep.subr.mxu0 %v1837_v58 }
 0xca3   : > { %2590 = vmatpush3.msra.mxu0 %v1837_v58 }
 0xca4   : > { %2094 = vmatprep.subr.mxu0 %v2772_v61 }
 0xd56   : > { %v2576_v62 = vpop.f32.mrf.mxu0 }
 0xd57   : > { %1881 = vrot.lane.b32.xlu1 %v2576_v62, %s2776_s30  ;;  %v1852_v52 = vrot.slane %v2576_v62, 7  ;;  %v1858_v60 = vrot.slane %v2576_v62, 1  ;;  %v1864_v7 = vrot.slane %v2576_v62, 2  ;;  %v1846_v20 = vrot.slane %v2576_v62, 6  ;;  %v2013_v62 = vld [vmem:[%s3804_s4 + $0x3a0] sm:$0xff] }
 0xd58   : > { %v1828_v63 = vpop.f32.mrf.mxu0 }
 0xd59   : > { %v1851_v53 = vrot.slane %v1828_v63, 7  ;;  %v1857_v57 = vrot.slane %v1828_v63, 1  ;;  %1879 = vrot.lane.b32.xlu0 %v1828_v63, %s2776_s30  ;;  %v1863_v4 = vrot.slane %v1828_v63, 2  ;;  %v1845_v15 = vrot.slane %v1828_v63, 6  ;;  %v2012_v63 = vld [vmem:[%s3804_s4 + $0x398] sm:$0xff]  ;;  %s2276_s30 = scalar_lea.sflag [#allocation3], %s216_s25 }
 0xd5b   : > { %v1854_v0 = vsel %vm277_vm0, %v1852_v52, %v1851_v53  ;;  %v1853_v1 = vsel %vm277_vm0, %v1851_v53, %v1852_v52  ;;  %v1859_v5 = vsel %vm284_vm1, %v1857_v57, %v1858_v60  ;;  %v1860_v6 = vsel %vm284_vm1, %v1858_v60, %v1857_v57  ;;  %v2011_v52 = vld [vmem:[%s3804_s4 + $0x390] sm:$0xff]  ;;  %v2010_v53 = vld [vmem:[%s3804_s4 + $0x388] sm:$0xff]  ;;  %v2397_v57 = vld [vmem:[%s3804_s4 + $0x378] ss:$0 sm:$0xff] }
 0xd5c   : > { %v1855_v2 = vmul.f32 %v1854_v0, %v2895_v18  ;;  %v1856_v3 = vmul.f32 %v1853_v1, %v2907_v25  ;;  %v1861_v8 = vmul.f32 %v1859_v5, %v2893_v17  ;;  %v1862_v10 = vmul.f32 %v1860_v6, %v2910_v26  ;;  %v2009_v6 = vld [vmem:[%s3804_s4 + $0x380] sm:$0xff] }
 0xd5d   : > { %v1865_v11 = vsel %vm291_vm3, %v1863_v4, %v1864_v7  ;;  %v1866_v12 = vsel %vm291_vm3, %v1864_v7, %v1863_v4  ;;  %v1848_v21 = vsel %vm270_vm4, %v1846_v20, %v1845_v15  ;;  %v1847_v22 = vsel %vm270_vm4, %v1845_v15, %v1846_v20  ;;  %v2028_v7 = vld [vmem:[%s3804_s4 + $0x418] sm:$0xff] }
 0xd5e   : > { %1871 = vrot.lane.b32.xlu0 %v1855_v2, %s2777_s8  ;;  %1873 = vrot.lane.b32.xlu1 %v1856_v3, %s2777_s8  ;;  %v1867_v13 = vmul.f32 %v1865_v11, %v2919_v31  ;;  %v1868_v14 = vmul.f32 %v1866_v12, %v2922_v33  ;;  %v1849_v27 = vmul.f32 %v1848_v21, %v2926_v36  ;;  %s2702_s8 = scalar_lea.vmem %s2289_s7, 16 }
 0xd5f   : > { %v1850_v28 = vmul.f32 %v1847_v22, %v2928_v37  ;;  %p2703_p11 = scmp.ne.s32.totalorder %s2289_s7, %s2702_s8 }
 0xd61   : > { %p2704_p12 = pnand %p2703_p11, %p2851_p5 }
 0xd62   : > { %1887 = vrot.lane.b32.xlu0 %v1861_v8, %s2778_s9  ;;  %1889 = vrot.lane.b32.xlu1 %v1862_v10, %s2778_s9  ;;  %v2027_v8 = vld [vmem:[%s3804_s4 + $0x410] sm:$0xff]  ;;  %v2026_v10 = vld [vmem:[%s3804_s4 + $0x408] sm:$0xff]  ;;  %s2782_s9 = smov [#allocation2]  }
 0xd63   : > { %p2705_p13 = pneg %p2704_p12 }
 0xd66   : > { %1895 = vrot.lane.b32.xlu0 %v1867_v13, %s2779_s10  ;;  %1897 = vrot.lane.b32.xlu1 %v1868_v14, %s2779_s10  ;;  %v2025_v14 = vld [vmem:[%s3804_s4 + $0x400] sm:$0xff]  ;;  %s2706_s10 = sshll.u32 %s2782_s9, 4  ;;  %s2707_s10 = int_to_ptr.vmem [resolvable:$false] %s2706_s10 }
 0xd67   : > { %s2708_s22 = scalar_lea.vmem %s2707_s10, 32  ;;  %p2709_p0 = scmp.lt.s32.totalorder %s2289_s7, %s2707_s10 }
 0xd68   : > { %p2710_p1 = scmp.lt.s32.totalorder %s2708_s22, %s2702_s8 }
 0xd6a   : > { %p2711_p2 = por %p2710_p1, %p2709_p0 }
 0xd6c   : > { %p2712_p3 = pnand %p2711_p2, %p2705_p13 }
 0xdc9   : > { %v1882_v19 = vpop.permute.xlu1 %1881 }
 0xdcb   : > { %v1880_v16 = vpop.permute.xlu0 %1879 }
 0xdd0   : > { %v1872_v23 = vpop.permute.xlu0 %1871  ;;  %v1874_v24 = vpop.permute.xlu1 %1873 }
 0xdd1   : > { %v1901_v29 = vsel %vm347_vm9, %v1849_v27, %v1872_v23  ;;  %v1902_v30 = vsel %vm347_vm9, %v1850_v28, %v1874_v24 }
 0xdd2   : > { %v1903_v35 = vsel %vm858_vm7, %v1901_v29, %v1880_v16  ;;  %v1904_v38 = vsel %vm858_vm7, %v1902_v30, %v1882_v19 }
 0xdd4   : > { %v1888_v32 = vpop.permute.xlu0 %1887  ;;  %v1890_v34 = vpop.permute.xlu1 %1889 }
 0xdd5   : > { %v1905_v39 = vsel %vm861_vm8, %v1903_v35, %v1888_v32  ;;  %v1906_v40 = vsel %vm861_vm8, %v1904_v38, %v1890_v34 }
 0xdd8   : > { %v1896_v41 = vpop.permute.xlu0 %1895  ;;  %v1898_v42 = vpop.permute.xlu1 %1897 }
 0xdd9   : > { %v1907_v43 = vsel %vm864_vm10, %v1905_v39, %v1896_v41  ;;  %v1908_v44 = vsel %vm864_vm10, %v1906_v40, %v1898_v42 }
 0xdda   : > { %2591 = vmatprep.mubr.msk.f32.mxu0 %vm871_vm11, %v1907_v43 }
 0xddb   : > { %2592 = vmatmul.mubr.msk.f32.vlgmr.msra.gmra.mxu0 %vm871_vm11, %v1908_v44  ;;  %v2182_v44 = vld [vmem:[%s3804_s4 + $0x430] sm:$0x1] }
 0xddc   : > { %2095 = vmatpush1.msra.mxu0 %v2024_v45 }
 0xddd   : > { %2096 = vmatprep.subr.mxu0 %v2772_v61 }
 0xdde   : > { %2097 = vmatpush1.msra.mxu0 %v2023_v46 }
 0xddf   : > { %2098 = vmatprep.subr.mxu0 %v2772_v61 }
 0xde0   : > { %2099 = vmatpush1.msra.mxu0 %v2022_v47 }
 0xde1   : > { %2100 = vmatprep.subr.mxu0 %v2772_v61 }
 0xde2   : > { %2101 = vmatpush1.msra.mxu0 %v2021_v48 }
 0xde3   : > { %2102 = vmatprep.subr.mxu0 %v2772_v61 }
 0xde4   : > { %2103 = vmatpush1.msra.mxu0 %v2020_v49 }
 0xde5   : > { %2104 = vmatprep.subr.mxu0 %v2772_v61 }
 0xde6   : > { %2105 = vmatpush1.msra.mxu0 %v2019_v55 }
 0xde7   : > { %2106 = vmatprep.subr.mxu0 %v2772_v61 }
 0xde8   : > { %2107 = vmatpush1.msra.mxu0 %v2018_v54 }
 0xde9   : > { %2108 = vmatprep.subr.mxu0 %v2772_v61 }
 0xdea   : > { %2109 = vmatpush1.msra.mxu0 %v2017_v56 }
 0xdeb   : > { %2110 = vmatprep.subr.mxu0 %v2772_v61 }
 0xdec   : > { %2111 = vmatpush1.msra.mxu0 %v2016_v50 }
 0xded   : > { %2112 = vmatprep.subr.mxu0 %v2772_v61 }
 0xdee   : > { %2113 = vmatpush1.msra.mxu0 %v2015_v59 }
 0xdef   : > { %2114 = vmatprep.subr.mxu0 %v2772_v61 }
 0xdf0   : > { %2115 = vmatpush1.msra.mxu0 %v2014_v51 }
 0xdf1   : > { %2116 = vmatprep.subr.mxu0 %v2772_v61 }
 0xdf2   : > { %2117 = vmatpush1.msra.mxu0 %v2013_v62 }
 0xdf3   : > { %2118 = vmatprep.subr.mxu0 %v2772_v61 }
 0xdf4   : > { %2119 = vmatpush1.msra.mxu0 %v2012_v63 }
 0xdf5   : > { %2120 = vmatprep.subr.mxu0 %v2772_v61 }
 0xdf6   : > { %2121 = vmatpush1.msra.mxu0 %v2011_v52 }
 0xdf7   : > { %2122 = vmatprep.subr.mxu0 %v2772_v61 }
 0xdf8   : > { %2123 = vmatpush1.msra.mxu0 %v2010_v53 }
 0xdf9   : > { %2124 = vmatprep.subr.mxu0 %v2772_v61 }
 0xdfa   : > { %2125 = vmatpush1.msra.mxu0 %v2009_v6 }
 0xdfb   : > { %2150 = vmatprep.subr.mxu0 %v2772_v61 }
 0xdfc   : > { %2151 = vmatpush2.msra.mxu0 %v2028_v7 }
 0xdfd   : > { %2152 = vmatprep.subr.mxu0 %v2772_v61 }
 0xdfe   : > { %2153 = vmatpush2.msra.mxu0 %v2027_v8  ;;  %v2181_v8 = vld [vmem:[%s3804_s4 + $0x428] sm:$0x1] }
 0xdff   : > { %2154 = vmatprep.subr.mxu0 %v2772_v61 }
 0xe00   : > { %2155 = vmatpush2.msra.mxu0 %v2026_v10 }
 0xe01   : > { %2156 = vmatprep.subr.mxu0 %v2772_v61 }
 0xe02   : > { %2157 = vmatpush2.msra.mxu0 %v2025_v14 }
 0xe9b   : > { %v2593_v58 = vpop.f32.mrf.mxu0 }
 0xe9c   : > { %v1994_v60 = vadd.f32 %v2593_v58, %v2397_v57 }
 0xe9d   : > { %v1988_v0 = vpop.f32.mrf.mxu0 }
 0xe9e   : > { %v2000_v1 = vmin.f32 %v1994_v60, 0.0  ;;  %v1989_v2 = vadd.f32 %v2397_v57, %v1988_v0  ;;  %vm1998_vm2 = vcmp.gt.f32.partialorder %v1994_v60, 0.0 }
 0xea0   : > { %v2003_v3 = vmul.f32 1.442695, %v2000_v1  ;;  %v1999_v4 = vmin.f32 %v1989_v2, 0.0  ;;  %vm1997_vm9 = vcmp.gt.f32.partialorder %v1989_v2, 0.0 }
 0xea2   : > { %2688 = vpow2.f32 %v2003_v3  ;;  %v2001_v5 = vmul.f32 1.442695, %v1999_v4 }
 0xea4   : > { %2690 = vpow2.f32 %v2001_v5 }
 0xeaf   : > { %v2689_v11 = vpop.eup %2688 }
 0xeb0   : > { %v2402_v12 = vadd.f32 -1.0, %v2689_v11 }
 0xeb1   : > { %v2691_v13 = vpop.eup %2690 }
 0xeb2   : > { %v2008_v15 = vsel %vm1998_vm2, %v1994_v60, %v2402_v12  ;;  %v2401_v16 = vadd.f32 -1.0, %v2691_v13 }
 0xeb3   : > { %v2049_v19 = vrot.slane %v2008_v15, 2  ;;  %v2037_v21 = vrot.slane %v2008_v15, 7  ;;  %v2031_v28 = vrot.slane %v2008_v15, 6  ;;  %v2043_v34 = vrot.slane %v2008_v15, 1 }
 0xeb4   : > { %v2007_v20 = vsel %vm1997_vm9, %v1989_v2, %v2401_v16 }
 0xeb5   : > { %v2030_v22 = vrot.slane %v2007_v20, 6  ;;  %v2048_v23 = vrot.slane %v2007_v20, 2  ;;  %2064 = vrot.lane.b32.xlu1 %v2007_v20, %s2773_s16  ;;  %v2036_v24 = vrot.slane %v2007_v20, 7  ;;  %v2042_v27 = vrot.slane %v2007_v20, 1 }
 0xeb7   : > { %v2050_v29 = vsel %vm291_vm3, %v2048_v23, %v2049_v19  ;;  %v2039_v30 = vsel %vm277_vm0, %v2037_v21, %v2036_v24  ;;  %v2038_v32 = vsel %vm277_vm0, %v2036_v24, %v2037_v21  ;;  %v2044_v40 = vsel %vm284_vm1, %v2042_v27, %v2043_v34 }
 0xeb8   : > { %v2052_v35 = vmul.f32 %v2050_v29, %v2919_v31  ;;  %v2040_v38 = vmul.f32 %v2039_v30, %v2895_v18  ;;  %v2041_v39 = vmul.f32 %v2038_v32, %v2907_v25  ;;  %v2033_v41 = vsel %vm270_vm4, %v2031_v28, %v2030_v22 }
 0xeb9   : > { %v2032_v42 = vsel %vm270_vm4, %v2030_v22, %v2031_v28  ;;  %v2051_v43 = vsel %vm291_vm3, %v2049_v19, %v2048_v23  ;;  %v2045_v18 = vsel %vm284_vm1, %v2043_v34, %v2042_v27  ;;  %v2046_v25 = vmul.f32 %v2044_v40, %v2893_v17 }
 0xeba   : > { %2404 = vmatprep.mubr.msk.f32.mxu0 %vm514_vm12, %v2052_v35  ;;  %2056 = vrot.lane.b32.xlu0 %v2040_v38, %s2774_s17  ;;  %v2047_v31 = vmul.f32 %v2045_v18, %v2910_v26  ;;  %v2034_v9 = vmul.f32 %v2033_v41, %v2926_v36  ;;  %v2053_v55 = vmul.f32 %v2051_v43, %v2922_v33  ;;  %vm2781_vm0 = vmmov 0   ;;  %v2403_v33 = vld [vmem:[%s3804_s4 + $0x420] ss:$0 sm:$0xff] }
 0xebb   : > { %2058 = vrot.lane.b32.xlu1 %v2041_v39, %s2774_s17  ;;  %v2035_v54 = vmul.f32 %v2032_v42, %v2928_v37  ;;  %2598 = vmatprep.mubr.msk.f32.mxu1 %vm2781_vm0, %v2772_v61  ;;  %vm2273_vm4 = vcmask 122880  }
 0xebe   : > { %2072 = vrot.lane.b32.xlu0 %v2046_v25, %s2775_s23 }
 0xebf   : > { %2074 = vrot.lane.b32.xlu1 %v2047_v31, %s2775_s23 }
 0xec2   : > { %2066 = vrot.lane.b32.xlu0 %v2008_v15, %s2773_s16 }
 0xec6   : > { %2185 = vperm.xlu0 %2663, %v2182_v44  }
 0xf27   : > { %v2065_v45 = vpop.permute.xlu1 %2064 }
 0xf2c   : > { %v2057_v46 = vpop.permute.xlu0 %2056 }
 0xf2d   : > { %v2078_v47 = vsel %vm514_vm12, %v2034_v9, %v2057_v46  ;;  %v2059_v17 = vpop.permute.xlu1 %2058 }
 0xf2e   : > { %v2080_v26 = vsel %vm517_vm13, %v2078_v47, %v2065_v45  ;;  %v2079_v56 = vsel %vm514_vm12, %v2035_v54, %v2059_v17 }
 0xf30   : > { %v2073_v48 = vpop.permute.xlu0 %2072 }
 0xf31   : > { %v2082_v49 = vsel %vm520_vm14, %v2080_v26, %v2073_v48  ;;  %v2075_v36 = vpop.permute.xlu1 %2074 }
 0xf32   : > { %2159 = vmatmul.mubr.f32.vlgmr.msra.gmra.mxu0 %v2082_v49 }
 0xf33   : > { %2405 = vmatprep.mubr.msk.f32.mxu0 %vm514_vm12, %v2053_v55 }
 0xf34   : > { %v2067_v50 = vpop.permute.xlu0 %2066 }
 0xf35   : > { %v2081_v59 = vsel %vm517_vm13, %v2079_v56, %v2067_v50 }
 0xf36   : > { %v2083_v51 = vsel %vm520_vm14, %v2081_v59, %v2075_v36 }
 0xf37   : > { %2164 = vmatmul.mubr.f32.gmra.mxu0 %v2083_v51 }
 0xf41   : > { %v2186_v10 = vpop.permute.xlu0 %2185 }
 0xff2   : > { %v2160_v37 = vpop.f32.mrf.mxu0 }
 0xff3   : > { %v2161_v62 = vadd.f32 %v2403_v33, %v2160_v37 }
 0xff4   : > { %v2162_v63 = vpop.f32.mrf.mxu0 }
 0xff5   : > { %v2171_v52 = vmin.f32 %v2161_v62, 0.0  ;;  %vm2169_vm3 = vcmp.gt.f32.partialorder %v2161_v62, 0.0 }
 0xff7   : > { %v2165_v53 = vpop.f32.mrf.mxu0  ;;  %v2173_v58 = vmul.f32 1.442695, %v2171_v52 }
 0xff8   : > { %v2166_v57 = vadd.f32 %v2403_v33, %v2165_v53 }
 0xff9   : > { %v2167_v60 = vpop.f32.mrf.mxu0  ;;  %2692 = vpow2.f32 %v2173_v58 }
 0xffa   : > { %v2172_v0 = vmin.f32 %v2166_v57, 0.0  ;;  %vm2170_vm1 = vcmp.gt.f32.partialorder %v2166_v57, 0.0 }
 0xffc   : > { %v2175_v1 = vmul.f32 1.442695, %v2172_v0 }
 0xffe   : > { %2694 = vpow2.f32 %v2175_v1 }
0x1006   : > { %v2693_v2 = vpop.eup %2692 }
0x1007   : > { %v2406_v5 = vadd.f32 -1.0, %v2693_v2 }
0x1009   : > { %v2179_v7 = vsel %vm2169_vm3, %v2161_v62, %v2406_v5 }
0x100b   : > { %v2695_v3 = vpop.eup %2694 }
0x100c   : > { %v2407_v4 = vadd.f32 -1.0, %v2695_v3 }
0x100e   : > { %v2180_v6 = vsel %vm2170_vm1, %v2166_v57, %v2407_v4 }
0x100f   : > { %2595 = vmatpush3.xpose.msk.msra.mxu1 %vm514_vm12, %v2180_v6 }
0x1010   : > { %2596 = vmatprep.subr.mxu1 %v2772_v61 }
0x1013   : > { %2597 = vmatpush3.xpose.msk.msra.mxu1 %vm514_vm12, %v2179_v7 }
0x1016   : > { %2599 = vmatmul.mubr.msk.f32.vlgmr.msra.gmra.mxu1 %vm514_vm12, %v2181_v8 }
0x10d6   : > { %v2263_v11 = vpop.f32.mrf.mxu1 }
0x10d7   : > { %v2264_v12 = vadd.f32 %v2263_v11, %v2186_v10 }
0x10d8   : > { %v2600_v13 = vpop.f32.mrf.mxu1 }
0x10d9   : > { %v2411_v14 = vmul.f32 -1.442695, %v2264_v12 }
0x10db   : > { %2696 = vpow2.f32 %v2411_v14 }
0x10e8   : > { %v2697_v15 = vpop.eup %2696 }
0x10e9   : > { %v2270_v61 = vadd.f32 1.0, %v2697_v15 }
0x10eb   : > { %2698 = vrcp.f32 %v2270_v61 }
0x10f8   : > { %v2699_v16 = vpop.eup %2698 }
0x10f9   : > { %2274 = vst.msk [vmem:[%s217_s6] sm:$0x1] %vm2273_vm4, %v2699_v16 }
0x10fa   : > { %2715 = shalt.err (!%p2712_p3)
}
0x10fb   : > { %s2716_s14 = scalar_lea.hbm %s3765_s13, 16  ;;  %s2720_s23 = scalar_lea.hbm %s3805_s5, 32 }
0x10fc   : > { %p2717_p4 = scmp.ne.s32.totalorder %s3765_s13, %s2716_s14  ;;  %p2721_p9 = scmp.lt.s32.totalorder %s3765_s13, %s3805_s5 }
0x10fd   : > { %p2722_p10 = scmp.lt.s32.totalorder %s2720_s23, %s2716_s14 }
0x10fe   : > { %p2718_p7 = pnand %p2717_p4, %p2851_p5 }
0x10ff   : > { %p2723_p11 = por %p2722_p10, %p2721_p9 }
0x1100   : > { %p2719_p8 = pneg %p2718_p7 }
0x1102   : > { %p2724_p12 = pnand %p2723_p11, %p2719_p8 }
0x1104   : > { %2727 = shalt.err (!%p2724_p12)
}
0x1105   : > { %2601 = dma.vmem_to_hbm [thread:$0]  (%p2851_p5), %s2289_s7, 16, %s3765_s13, %s2276_s30  }
0x1106 PF: > { %p2607_p13 = scmp.ge.s32.totalorder %s2762_s21, 2  ;;  %s2300_s26 = sand.u32 1, %s2750_s18  }
0x1107   : > { %s2301_s6 = scalar_lea.sflag [#allocation3], %s2300_s26 }
0x1108   : > { %p2604_p0 = pnand %p2607_p13, %p2855_p6 }
0x110a   : > { %p2605_p1 = pneg %p2604_p0 }
0x110c   : > { %2745 = dma.done.wait (%p2605_p1), %s2301_s6, 16  }
0x110d   : > { %2747 = vsyncadd (%p2605_p1), %s2301_s6, 4294967280  ;;  %p15_p2 = scmp.ge.s32.totalorder %s2838_s24, 4   ;;  %s3808_s18 = smov %s2754_s19 }
0x110e   : > { %s3809_s19 = smov %s2758_s20  ;;  %s3810_s20 = smov %s2849_s27 }
0x110f   : > { %s3811_s21 = smov %s2838_s24  ;;  %17 = sbr.rel (!%p15_p2) target bundleno = 3 (0x3), region = 75 }
0x1114   :  { %2305 = vsyncpa [#allocation3], 1 }
0x1115   :  { %2307 = vsyncpa [#allocation3 + $0x1], 1 }

</bundles_post_ra>
